<compile_context>
chip_gen: v7x
topology: tpu7x:2x2x1
jax: 0.10.0
libtpu: 0.0.40
codegen_flags: <defaults>
</compile_context>

<pallas_src>
import jax
import jax.numpy as jnp
from jax import lax
from jax.experimental import pallas as pl
from jax.experimental.pallas import tpu as pltpu


def make_kernel(num_lstm_layer, num_linear_layer, T, B, F, H):
    """Fused wavefront LSTM stack + linear head. All layer counts / shapes static."""
    L = num_lstm_layer
    G = 4 * H
    LG = L * G

    def kernel(*refs):
        # ref order: x2, w_ih0_pad, bias_full, slab_0..slab_{L-1},
        #            (w_t, b) * num_linear_layer, out_ref
        idx = 0
        x_ref = refs[idx]; idx += 1          # (T*B, F) bf16, time-major rows (row = t*B + b)
        wih0_ref = refs[idx]; idx += 1       # (F, L*4H) bf16: layer-0 W_ih^T, zero-padded cols
        bias_ref = refs[idx]; idx += 1       # (1, L*4H) f32: every layer's bias in its col block
        slab_refs = [refs[idx + l] for l in range(L)]; idx += L   # (H, L*4H) bf16 each
        lin_params = []
        for _ in range(num_linear_layer):
            lin_params.append((refs[idx], refs[idx + 1])); idx += 2
        out_ref = refs[idx]

        # Lane mask selecting the 'g' (cell-candidate) block [2H, 3H) inside EVERY
        # layer's 4H gate group; built once, reused every wavefront step.
        lane = lax.broadcasted_iota(jnp.int32, (B, LG), 1)
        g_mask = (lane >= 2 * H) & (lane < 3 * H)
        for l in range(1, L):
            g_mask = g_mask | ((lane >= l * G + 2 * H) & (lane < l * G + 3 * H))

        def activate(gates):
            # tanh(x) = 2*sigmoid(2x) - 1: one full-width EUP sigmoid per wavefront step
            # instead of sigmoid + tanh + select (halves the per-step EUP passes).
            pre = jnp.where(g_mask, gates * 2.0, gates)
            s = jax.nn.sigmoid(pre)
            return jnp.where(g_mask, s * 2.0 - 1.0, s)

        # Hoisted layer-0 input projection + ALL biases: one batched MXU matmul.
        # Columns [G:) of wih0 are zero, so those lanes of each row are exactly the
        # per-layer biases of layers >= 1 (constant across rows).
        proj = jnp.dot(x_ref[...], wih0_ref[...],
                       preferred_element_type=jnp.float32) + bias_ref[...]  # (T*B, L*4H) f32

        slabs = [slab_refs[l][...] for l in range(L)]      # hoisted weight loads (bf16)

        h = [jnp.zeros((B, H), jnp.float32) for _ in range(L)]
        h_bf = [jnp.zeros((B, H), jnp.bfloat16) for _ in range(L)]
        c = [jnp.zeros((B, H), jnp.float32) for _ in range(L)]

        # Wavefront-pipelined recurrence, fully unrolled (T, L static & small).
        # Source-layer slab l is only included on wavefront steps where its
        # contribution is consumed and its hidden state is nonzero.
        for w in range(T + L - 1):
            row = min(w, T - 1)                            # any valid row once layer 0 is done
            gates_all = proj[row * B:(row + 1) * B, :]     # (B, L*4H) f32
            for l in range(L):
                lo = l + 1
                hi = (T + l) if (l + 1 < L) else (T - 1 + l)
                if lo <= w <= hi:
                    gates_all = gates_all + jnp.dot(
                        h_bf[l], slabs[l], preferred_element_type=jnp.float32)
            act = activate(gates_all)                      # (B, L*4H) f32, one EUP pass
            for l in range(L):
                t = w - l
                if t < 0 or t >= T:
                    continue
                base = l * G
                # TODO(synk): if the four 32-lane extracts show on the critical path in
                # the bundle dump, switch the c/h update to full-width (B, L*H) form.
                i_g = act[:, base + 0 * H: base + 1 * H]
                f_g = act[:, base + 1 * H: base + 2 * H]
                g_g = act[:, base + 2 * H: base + 3 * H]
                o_g = act[:, base + 3 * H: base + 4 * H]
                c[l] = f_g * c[l] + i_g * g_g
                h[l] = o_g * jnp.tanh(c[l])
                h_bf[l] = h[l].astype(jnp.bfloat16)

        # Linear head on the last LSTM layer's final hidden state.
        out = h[L - 1]
        for i in range(num_linear_layer):
            w_ref, b_ref = lin_params[i]
            out = jnp.dot(out.astype(jnp.bfloat16), w_ref[...],
                          preferred_element_type=jnp.float32) + b_ref[...]
            if i < num_linear_layer - 1:
                out = jnp.maximum(out, 0.0)   # ReLU; F.dropout(p=0.0) is identity.
                # TODO(synk): dropout with p > 0 not implemented (module default is 0.0).
        out_ref[...] = out.astype(out_ref.dtype)

    return kernel


def majorminor_forward(x, lstm_params, lin_params, H, label_length):
    """x: (B, T, F) batch-first f32 (like the PyTorch module); params stored in f32."""
    B, T, F = x.shape
    L = len(lstm_params)
    G = 4 * H
    LG = L * G
    bf16 = jnp.bfloat16

    # Time-major 2-D flatten (row = t*B + b); only x is rearranged host-side.
    x2 = jnp.transpose(x, (1, 0, 2)).reshape(T * B, F).astype(bf16)

    # Pack the LSTM weights into the wavefront layout:
    #   wih0_pad (F, L*4H):  layer-0 W_ih^T in cols [0, 4H), zeros elsewhere
    #   bias_full (1, L*4H): layer-l bias in cols [l*4H, (l+1)*4H)
    #   slab_l   (H, L*4H):  W_hh_l^T in its own col block, W_ih_{l+1}^T in the next
    wih0_pad = jnp.zeros((F, LG), jnp.float32).at[:, 0:G].set(lstm_params[0][0])
    bias_full = jnp.zeros((1, LG), jnp.float32)
    slabs = []
    for l, (w_ih_t, w_hh_t, b) in enumerate(lstm_params):
        bias_full = bias_full.at[:, l * G:(l + 1) * G].set(b)
        slab = jnp.zeros((H, LG), jnp.float32)
        slab = slab.at[:, l * G:(l + 1) * G].set(w_hh_t)
        if l + 1 < L:
            slab = slab.at[:, (l + 1) * G:(l + 2) * G].set(lstm_params[l + 1][0])
        slabs.append(slab.astype(bf16))

    args = [x2, wih0_pad.astype(bf16), bias_full] + slabs
    for (w_t, b) in lin_params:
        args += [w_t.astype(bf16), b]

    # Rough cost model so XLA schedules surrounding ops around this long serial kernel.
    flops = 2 * (T * B) * F * LG                    # hoisted projection
    flops += L * T * 2 * B * H * LG                 # wavefront slab matmuls
    flops += (T + L - 1) * B * LG * 6 + T * L * B * 8 * H
    for (w_t, _) in lin_params:
        din, dout = w_t.shape
        flops += 2 * B * din * dout
    trans = (T + L - 1) * B * LG + T * L * B * H    # sigmoid full-width, tanh(c)
    bytes_accessed = int(sum(int(a.size) * a.dtype.itemsize for a in args)
                         + B * label_length * 4)

    kernel = make_kernel(L, len(lin_params), T, B, F, H)
    vmem_specs = [pl.BlockSpec(memory_space=pltpu.MemorySpace.VMEM)] * len(args)

    return pl.pallas_call(
        kernel,
        out_shape=jax.ShapeDtypeStruct((B, label_length), jnp.float32),
        in_specs=vmem_specs,
        out_specs=pl.BlockSpec(memory_space=pltpu.MemorySpace.VMEM),
        compiler_params=pltpu.CompilerParams(vmem_limit_bytes=2 * 1024 * 1024),
        cost_estimate=pl.CostEstimate(flops=int(flops), transcendentals=int(trans),
                                      bytes_accessed=bytes_accessed),
    )(*args)


def init_params(key, F, H, label_length, num_lstm_layer, num_linear_layer):
    """Deterministic parameter init mimicking the PyTorch module's shapes (f32).

    LSTM layer l: W_ih (4H, in), W_hh (4H, H), b_ih (4H,), b_hh (4H,)
      -> stored transposed (in, 4H), (H, 4H), combined bias (1, 4H).
    Linear i: W (out, in), b (out,) -> stored transposed (in, out), bias (1, out).
    """
    k = 1.0 / jnp.sqrt(H)
    lstm_params = []
    for l in range(num_lstm_layer):
        in_size = F if l == 0 else H
        key, k1, k2, k3, k4 = jax.random.split(key, 5)
        w_ih_t = jax.random.uniform(k1, (in_size, 4 * H), jnp.float32, -k, k)
        w_hh_t = jax.random.uniform(k2, (H, 4 * H), jnp.float32, -k, k)
        b_ih = jax.random.uniform(k3, (4 * H,), jnp.float32, -k, k)
        b_hh = jax.random.uniform(k4, (4 * H,), jnp.float32, -k, k)
        lstm_params.append((w_ih_t, w_hh_t, (b_ih + b_hh).reshape(1, 4 * H)))

    # Linear layer sizes (grow_ratio = 1), exactly as in __init__:
    dims = []
    grow_ratio = 1
    for i in range(num_linear_layer):
        if i == 0:
            dims.append((H, grow_ratio * H))
        elif i < num_linear_layer - 1:
            dims.append((grow_ratio * H // 2 ** (i - 1), grow_ratio * H // 2 ** i))
        else:
            dims.append((grow_ratio * H // 2 ** (i - 1), label_length))

    lin_params = []
    for (din, dout) in dims:
        key, k1, k2 = jax.random.split(key, 3)
        bound = 1.0 / jnp.sqrt(din)
        w_t = jax.random.uniform(k1, (din, dout), jnp.float32, -bound, bound)
        b = jax.random.uniform(k2, (1, dout), jnp.float32, -bound, bound)
        lin_params.append((w_t, b))
    return lstm_params, lin_params


def reference_forward_f32(x, lstm_params, lin_params, H):
    """Pure-f32 JAX reference matching the PyTorch forward (semantic fidelity check)."""
    B, T, F = x.shape
    seq = x
    h = jnp.zeros((B, H), jnp.float32)
    for (w_ih_t, w_hh_t, b) in lstm_params:
        h = jnp.zeros((B, H), jnp.float32)
        c = jnp.zeros((B, H), jnp.float32)
        outs = []
        for t in range(T):
            gates = seq[:, t, :] @ w_ih_t + h @ w_hh_t + b
            i_g = jax.nn.sigmoid(gates[:, :H])
            f_g = jax.nn.sigmoid(gates[:, H:2 * H])
            g_g = jnp.tanh(gates[:, 2 * H:3 * H])
            o_g = jax.nn.sigmoid(gates[:, 3 * H:])
            c = f_g * c + i_g * g_g
            h = o_g * jnp.tanh(c)
            outs.append(h)
        seq = jnp.stack(outs, axis=1)
    hid = h
    for i, (w_t, b) in enumerate(lin_params):
        hid = hid @ w_t + b
        if i < len(lin_params) - 1:
            hid = jnp.maximum(hid, 0.0)
    return hid


def reference_forward_bf16(x, lstm_params, lin_params, H):
    """Reference mirroring the kernel numerics: bf16 MXU operands, f32 accumulation,
    hoisted layer-0 projection, sigmoid-only gate activation."""
    B, T, F = x.shape
    bf = jnp.bfloat16
    G = 4 * H
    gidx = jnp.arange(G)
    g_mask = (gidx >= 2 * H) & (gidx < 3 * H)

    def activate(gates):
        pre = jnp.where(g_mask, gates * 2.0, gates)
        s = jax.nn.sigmoid(pre)
        return jnp.where(g_mask, s * 2.0 - 1.0, s)

    x2 = jnp.transpose(x, (1, 0, 2)).reshape(T * B, F).astype(bf)   # time-major rows
    prev_h = None
    h = jnp.zeros((B, H), jnp.float32)
    for l, (w_ih_t, w_hh_t, b) in enumerate(lstm_params):
        w_ih_bf = w_ih_t.astype(bf)
        w_hh_bf = w_hh_t.astype(bf)
        if l == 0:
            proj = jnp.dot(x2, w_ih_bf, preferred_element_type=jnp.float32) + b
        h = jnp.zeros((B, H), jnp.float32)
        c = jnp.zeros((B, H), jnp.float32)
        outs = []
        for t in range(T):
            if l == 0:
                gates = proj[t * B:(t + 1) * B, :]
            else:
                gates = jnp.dot(prev_h[t], w_ih_bf,
                                preferred_element_type=jnp.float32) + b
            gates = gates + jnp.dot(h.astype(bf), w_hh_bf,
                                    preferred_element_type=jnp.float32)
            a = activate(gates)
            i_g, f_g = a[:, :H], a[:, H:2 * H]
            g_g, o_g = a[:, 2 * H:3 * H], a[:, 3 * H:]
            c = f_g * c + i_g * g_g
            h = o_g * jnp.tanh(c)
            outs.append(h.astype(bf))
        prev_h = outs
    hid = h
    for i, (w_t, b) in enumerate(lin_params):
        hid = jnp.dot(hid.astype(bf), w_t.astype(bf),
                      preferred_element_type=jnp.float32) + b
        if i < len(lin_params) - 1:
            hid = jnp.maximum(hid, 0.0)
    return hid


if __name__ == "__main__":
    # Small, module-consistent shapes.
    B, T = 2, 8                 # batch_size, sequence length
    F = 4                       # feature_size
    H = 32                      # hidden_size
    LBL = 5                     # label_length
    NUM_LSTM = 2                # num_lstm_layer
    NUM_LIN = 3                 # num_linear_layer
    # drop_frac = 0.0 (dropout is identity)

    key = jax.random.PRNGKey(0)
    key, kx = jax.random.split(key)
    x = jax.random.normal(kx, (B, T, F), jnp.float32)   # batch-first, like the PyTorch module

    lstm_params, lin_params = init_params(key, F, H, LBL, NUM_LSTM, NUM_LIN)

    out = majorminor_forward(x, lstm_params, lin_params, H, LBL)
    out = jax.block_until_ready(out)
    assert out.shape == (B, LBL), out.shape

    # Tight check vs. a reference with matching numerics (bf16 operands, f32 accum,
    # sigmoid-only gate activation).
    ref_bf16 = reference_forward_bf16(x, lstm_params, lin_params, H)
    err_bf16 = float(jnp.max(jnp.abs(out - ref_bf16)))
    assert err_bf16 < 2e-3, f"mismatch vs bf16-matmul reference: {err_bf16}"

    # Loose fidelity check vs. the pure-f32 PyTorch-semantics reference.
    ref_f32 = reference_forward_f32(x, lstm_params, lin_params, H)
    err_f32 = float(jnp.max(jnp.abs(out - ref_f32)))
    assert err_f32 < 5e-2, f"mismatch vs f32 reference: {err_f32}"

    print("KERNEL_OK")
</pallas_src>

<mosaic_0001>
module attributes {stable_mosaic.version = 11 : i64} {
  func.func @kernel(%arg0: memref<16x4xbf16, #tpu.memory_space<vmem>>, %arg1: memref<4x256xbf16, #tpu.memory_space<vmem>>, %arg2: memref<1x256xf32, #tpu.memory_space<vmem>>, %arg3: memref<32x256xbf16, #tpu.memory_space<vmem>>, %arg4: memref<32x256xbf16, #tpu.memory_space<vmem>>, %arg5: memref<32x32xbf16, #tpu.memory_space<vmem>>, %arg6: memref<1x32xf32, #tpu.memory_space<vmem>>, %arg7: memref<32x16xbf16, #tpu.memory_space<vmem>>, %arg8: memref<1x16xf32, #tpu.memory_space<vmem>>, %arg9: memref<16x5xbf16, #tpu.memory_space<vmem>>, %arg10: memref<1x5xf32, #tpu.memory_space<vmem>>, %arg11: memref<2x5xf32, #tpu.memory_space<vmem>>) attributes {dimension_semantics = [], scalar_prefetch = 0 : i64, scratch_operands = 0 : i64, tpu.core_type = #tpu.core_type<tc>} {
    %0 = tpu.iota {dimensions = array<i32: 1>} : vector<2x256xi32>
    %c64_i32 = arith.constant 64 : i32
    %1 = vector.broadcast %c64_i32 : i32 to vector<2x256xi32>
    %2 = arith.cmpi sge, %0, %1 : vector<2x256xi32>
    %c96_i32 = arith.constant 96 : i32
    %3 = vector.broadcast %c96_i32 : i32 to vector<2x256xi32>
    %4 = arith.cmpi slt, %0, %3 : vector<2x256xi32>
    %5 = arith.andi %2, %4 : vector<2x256xi1>
    %c192_i32 = arith.constant 192 : i32
    %6 = vector.broadcast %c192_i32 : i32 to vector<2x256xi32>
    %7 = arith.cmpi sge, %0, %6 : vector<2x256xi32>
    %c224_i32 = arith.constant 224 : i32
    %8 = vector.broadcast %c224_i32 : i32 to vector<2x256xi32>
    %9 = arith.cmpi slt, %0, %8 : vector<2x256xi32>
    %10 = arith.andi %7, %9 : vector<2x256xi1>
    %11 = arith.ori %5, %10 : vector<2x256xi1>
    %c0 = arith.constant 0 : index
    %c0_0 = arith.constant 0 : index
    %12 = vector.load %arg0[%c0, %c0_0] : memref<16x4xbf16, #tpu.memory_space<vmem>>, vector<16x4xbf16>
    %c0_1 = arith.constant 0 : index
    %c0_2 = arith.constant 0 : index
    %13 = vector.load %arg1[%c0_1, %c0_2] : memref<4x256xbf16, #tpu.memory_space<vmem>>, vector<4x256xbf16>
    %cst = arith.constant dense<0.000000e+00> : vector<16x256xf32>
    %14 = tpu.matmul %12, %13, %cst {dimension_numbers = #tpu.dot_dimension_numbers<[1], [0], [0], [1], [0, 0, 1, 1], [], []>} : vector<16x4xbf16>, vector<4x256xbf16>, vector<16x256xf32> -> vector<16x256xf32>
    %c0_3 = arith.constant 0 : index
    %c0_4 = arith.constant 0 : index
    %15 = vector.load %arg2[%c0_3, %c0_4] : memref<1x256xf32, #tpu.memory_space<vmem>>, vector<1x256xf32>
    %16 = vector.broadcast %15 : vector<1x256xf32> to vector<16x256xf32>
    %17 = arith.addf %14, %16 : vector<16x256xf32>
    %c0_5 = arith.constant 0 : index
    %c0_6 = arith.constant 0 : index
    %18 = vector.load %arg3[%c0_5, %c0_6] : memref<32x256xbf16, #tpu.memory_space<vmem>>, vector<32x256xbf16>
    %c0_7 = arith.constant 0 : index
    %c0_8 = arith.constant 0 : index
    %19 = vector.load %arg4[%c0_7, %c0_8] : memref<32x256xbf16, #tpu.memory_space<vmem>>, vector<32x256xbf16>
    %cst_9 = arith.constant 0.000000e+00 : f32
    %20 = vector.broadcast %cst_9 : f32 to vector<2x32xf32>
    %cst_10 = arith.constant 0.000000e+00 : f32
    %21 = vector.broadcast %cst_10 : f32 to vector<2x32xf32>
    %22 = vector.extract_strided_slice %17 {offsets = [0, 0], sizes = [2, 256], strides = [1, 1]} : vector<16x256xf32> to vector<2x256xf32>
    %cst_11 = arith.constant 2.000000e+00 : f32
    %23 = vector.broadcast %cst_11 : f32 to vector<2x256xf32>
    %24 = arith.mulf %22, %23 : vector<2x256xf32>
    %25 = arith.select %11, %24, %22 : vector<2x256xi1>, vector<2x256xf32>
    %26 = arith.negf %25 : vector<2x256xf32>
    %27 = math.exp %26 : vector<2x256xf32>
    %cst_12 = arith.constant 1.000000e+00 : f32
    %28 = vector.broadcast %cst_12 : f32 to vector<2x256xf32>
    %29 = arith.addf %28, %27 : vector<2x256xf32>
    %30 = arith.divf %28, %29 : vector<2x256xf32>
    %cst_13 = arith.constant 2.000000e+00 : f32
    %31 = vector.broadcast %cst_13 : f32 to vector<2x256xf32>
    %32 = arith.mulf %30, %31 : vector<2x256xf32>
    %cst_14 = arith.constant 1.000000e+00 : f32
    %33 = vector.broadcast %cst_14 : f32 to vector<2x256xf32>
    %34 = arith.subf %32, %33 : vector<2x256xf32>
    %35 = arith.select %11, %34, %30 : vector<2x256xi1>, vector<2x256xf32>
    %36 = vector.extract_strided_slice %35 {offsets = [0, 0], sizes = [2, 32], strides = [1, 1]} : vector<2x256xf32> to vector<2x32xf32>
    %37 = vector.extract_strided_slice %35 {offsets = [0, 32], sizes = [2, 32], strides = [1, 1]} : vector<2x256xf32> to vector<2x32xf32>
    %38 = vector.extract_strided_slice %35 {offsets = [0, 64], sizes = [2, 32], strides = [1, 1]} : vector<2x256xf32> to vector<2x32xf32>
    %39 = vector.extract_strided_slice %35 {offsets = [0, 96], sizes = [2, 32], strides = [1, 1]} : vector<2x256xf32> to vector<2x32xf32>
    %40 = arith.mulf %37, %20 : vector<2x32xf32>
    %41 = arith.mulf %36, %38 : vector<2x32xf32>
    %42 = arith.addf %40, %41 : vector<2x32xf32>
    %43 = math.tanh %42 : vector<2x32xf32>
    %44 = arith.mulf %39, %43 : vector<2x32xf32>
    %45 = arith.truncf %44 : vector<2x32xf32> to vector<2x32xbf16>
    %46 = vector.extract_strided_slice %17 {offsets = [2, 0], sizes = [2, 256], strides = [1, 1]} : vector<16x256xf32> to vector<2x256xf32>
    %cst_15 = arith.constant dense<0.000000e+00> : vector<2x256xf32>
    %47 = tpu.matmul %45, %18, %cst_15 {dimension_numbers = #tpu.dot_dimension_numbers<[1], [0], [0], [1], [0, 0, 1, 1], [], []>} : vector<2x32xbf16>, vector<32x256xbf16>, vector<2x256xf32> -> vector<2x256xf32>
    %48 = arith.addf %46, %47 : vector<2x256xf32>
    %cst_16 = arith.constant 2.000000e+00 : f32
    %49 = vector.broadcast %cst_16 : f32 to vector<2x256xf32>
    %50 = arith.mulf %48, %49 : vector<2x256xf32>
    %51 = arith.select %11, %50, %48 : vector<2x256xi1>, vector<2x256xf32>
    %52 = arith.negf %51 : vector<2x256xf32>
    %53 = math.exp %52 : vector<2x256xf32>
    %cst_17 = arith.constant 1.000000e+00 : f32
    %54 = vector.broadcast %cst_17 : f32 to vector<2x256xf32>
    %55 = arith.addf %54, %53 : vector<2x256xf32>
    %56 = arith.divf %54, %55 : vector<2x256xf32>
    %cst_18 = arith.constant 2.000000e+00 : f32
    %57 = vector.broadcast %cst_18 : f32 to vector<2x256xf32>
    %58 = arith.mulf %56, %57 : vector<2x256xf32>
    %cst_19 = arith.constant 1.000000e+00 : f32
    %59 = vector.broadcast %cst_19 : f32 to vector<2x256xf32>
    %60 = arith.subf %58, %59 : vector<2x256xf32>
    %61 = arith.select %11, %60, %56 : vector<2x256xi1>, vector<2x256xf32>
    %62 = vector.extract_strided_slice %61 {offsets = [0, 0], sizes = [2, 32], strides = [1, 1]} : vector<2x256xf32> to vector<2x32xf32>
    %63 = vector.extract_strided_slice %61 {offsets = [0, 32], sizes = [2, 32], strides = [1, 1]} : vector<2x256xf32> to vector<2x32xf32>
    %64 = vector.extract_strided_slice %61 {offsets = [0, 64], sizes = [2, 32], strides = [1, 1]} : vector<2x256xf32> to vector<2x32xf32>
    %65 = vector.extract_strided_slice %61 {offsets = [0, 96], sizes = [2, 32], strides = [1, 1]} : vector<2x256xf32> to vector<2x32xf32>
    %66 = arith.mulf %63, %42 : vector<2x32xf32>
    %67 = arith.mulf %62, %64 : vector<2x32xf32>
    %68 = arith.addf %66, %67 : vector<2x32xf32>
    %69 = math.tanh %68 : vector<2x32xf32>
    %70 = arith.mulf %65, %69 : vector<2x32xf32>
    %71 = arith.truncf %70 : vector<2x32xf32> to vector<2x32xbf16>
    %72 = vector.extract_strided_slice %61 {offsets = [0, 128], sizes = [2, 32], strides = [1, 1]} : vector<2x256xf32> to vector<2x32xf32>
    %73 = vector.extract_strided_slice %61 {offsets = [0, 160], sizes = [2, 32], strides = [1, 1]} : vector<2x256xf32> to vector<2x32xf32>
    %74 = vector.extract_strided_slice %61 {offsets = [0, 192], sizes = [2, 32], strides = [1, 1]} : vector<2x256xf32> to vector<2x32xf32>
    %75 = vector.extract_strided_slice %61 {offsets = [0, 224], sizes = [2, 32], strides = [1, 1]} : vector<2x256xf32> to vector<2x32xf32>
    %76 = arith.mulf %73, %21 : vector<2x32xf32>
    %77 = arith.mulf %72, %74 : vector<2x32xf32>
    %78 = arith.addf %76, %77 : vector<2x32xf32>
    %79 = math.tanh %78 : vector<2x32xf32>
    %80 = arith.mulf %75, %79 : vector<2x32xf32>
    %81 = arith.truncf %80 : vector<2x32xf32> to vector<2x32xbf16>
    %82 = vector.extract_strided_slice %17 {offsets = [4, 0], sizes = [2, 256], strides = [1, 1]} : vector<16x256xf32> to vector<2x256xf32>
    %cst_20 = arith.constant dense<0.000000e+00> : vector<2x256xf32>
    %83 = tpu.matmul %71, %18, %cst_20 {dimension_numbers = #tpu.dot_dimension_numbers<[1], [0], [0], [1], [0, 0, 1, 1], [], []>} : vector<2x32xbf16>, vector<32x256xbf16>, vector<2x256xf32> -> vector<2x256xf32>
    %84 = arith.addf %82, %83 : vector<2x256xf32>
    %cst_21 = arith.constant dense<0.000000e+00> : vector<2x256xf32>
    %85 = tpu.matmul %81, %19, %cst_21 {dimension_numbers = #tpu.dot_dimension_numbers<[1], [0], [0], [1], [0, 0, 1, 1], [], []>} : vector<2x32xbf16>, vector<32x256xbf16>, vector<2x256xf32> -> vector<2x256xf32>
    %86 = arith.addf %84, %85 : vector<2x256xf32>
    %cst_22 = arith.constant 2.000000e+00 : f32
    %87 = vector.broadcast %cst_22 : f32 to vector<2x256xf32>
    %88 = arith.mulf %86, %87 : vector<2x256xf32>
    %89 = arith.select %11, %88, %86 : vector<2x256xi1>, vector<2x256xf32>
    %90 = arith.negf %89 : vector<2x256xf32>
    %91 = math.exp %90 : vector<2x256xf32>
    %cst_23 = arith.constant 1.000000e+00 : f32
    %92 = vector.broadcast %cst_23 : f32 to vector<2x256xf32>
    %93 = arith.addf %92, %91 : vector<2x256xf32>
    %94 = arith.divf %92, %93 : vector<2x256xf32>
    %cst_24 = arith.constant 2.000000e+00 : f32
    %95 = vector.broadcast %cst_24 : f32 to vector<2x256xf32>
    %96 = arith.mulf %94, %95 : vector<2x256xf32>
    %cst_25 = arith.constant 1.000000e+00 : f32
    %97 = vector.broadcast %cst_25 : f32 to vector<2x256xf32>
    %98 = arith.subf %96, %97 : vector<2x256xf32>
    %99 = arith.select %11, %98, %94 : vector<2x256xi1>, vector<2x256xf32>
    %100 = vector.extract_strided_slice %99 {offsets = [0, 0], sizes = [2, 32], strides = [1, 1]} : vector<2x256xf32> to vector<2x32xf32>
    %101 = vector.extract_strided_slice %99 {offsets = [0, 32], sizes = [2, 32], strides = [1, 1]} : vector<2x256xf32> to vector<2x32xf32>
    %102 = vector.extract_strided_slice %99 {offsets = [0, 64], sizes = [2, 32], strides = [1, 1]} : vector<2x256xf32> to vector<2x32xf32>
    %103 = vector.extract_strided_slice %99 {offsets = [0, 96], sizes = [2, 32], strides = [1, 1]} : vector<2x256xf32> to vector<2x32xf32>
    %104 = arith.mulf %101, %68 : vector<2x32xf32>
    %105 = arith.mulf %100, %102 : vector<2x32xf32>
    %106 = arith.addf %104, %105 : vector<2x32xf32>
    %107 = math.tanh %106 : vector<2x32xf32>
    %108 = arith.mulf %103, %107 : vector<2x32xf32>
    %109 = arith.truncf %108 : vector<2x32xf32> to vector<2x32xbf16>
    %110 = vector.extract_strided_slice %99 {offsets = [0, 128], sizes = [2, 32], strides = [1, 1]} : vector<2x256xf32> to vector<2x32xf32>
    %111 = vector.extract_strided_slice %99 {offsets = [0, 160], sizes = [2, 32], strides = [1, 1]} : vector<2x256xf32> to vector<2x32xf32>
    %112 = vector.extract_strided_slice %99 {offsets = [0, 192], sizes = [2, 32], strides = [1, 1]} : vector<2x256xf32> to vector<2x32xf32>
    %113 = vector.extract_strided_slice %99 {offsets = [0, 224], sizes = [2, 32], strides = [1, 1]} : vector<2x256xf32> to vector<2x32xf32>
    %114 = arith.mulf %111, %78 : vector<2x32xf32>
    %115 = arith.mulf %110, %112 : vector<2x32xf32>
    %116 = arith.addf %114, %115 : vector<2x32xf32>
    %117 = math.tanh %116 : vector<2x32xf32>
    %118 = arith.mulf %113, %117 : vector<2x32xf32>
    %119 = arith.truncf %118 : vector<2x32xf32> to vector<2x32xbf16>
    %120 = vector.extract_strided_slice %17 {offsets = [6, 0], sizes = [2, 256], strides = [1, 1]} : vector<16x256xf32> to vector<2x256xf32>
    %cst_26 = arith.constant dense<0.000000e+00> : vector<2x256xf32>
    %121 = tpu.matmul %109, %18, %cst_26 {dimension_numbers = #tpu.dot_dimension_numbers<[1], [0], [0], [1], [0, 0, 1, 1], [], []>} : vector<2x32xbf16>, vector<32x256xbf16>, vector<2x256xf32> -> vector<2x256xf32>
    %122 = arith.addf %120, %121 : vector<2x256xf32>
    %cst_27 = arith.constant dense<0.000000e+00> : vector<2x256xf32>
    %123 = tpu.matmul %119, %19, %cst_27 {dimension_numbers = #tpu.dot_dimension_numbers<[1], [0], [0], [1], [0, 0, 1, 1], [], []>} : vector<2x32xbf16>, vector<32x256xbf16>, vector<2x256xf32> -> vector<2x256xf32>
    %124 = arith.addf %122, %123 : vector<2x256xf32>
    %cst_28 = arith.constant 2.000000e+00 : f32
    %125 = vector.broadcast %cst_28 : f32 to vector<2x256xf32>
    %126 = arith.mulf %124, %125 : vector<2x256xf32>
    %127 = arith.select %11, %126, %124 : vector<2x256xi1>, vector<2x256xf32>
    %128 = arith.negf %127 : vector<2x256xf32>
    %129 = math.exp %128 : vector<2x256xf32>
    %cst_29 = arith.constant 1.000000e+00 : f32
    %130 = vector.broadcast %cst_29 : f32 to vector<2x256xf32>
    %131 = arith.addf %130, %129 : vector<2x256xf32>
    %132 = arith.divf %130, %131 : vector<2x256xf32>
    %cst_30 = arith.constant 2.000000e+00 : f32
    %133 = vector.broadcast %cst_30 : f32 to vector<2x256xf32>
    %134 = arith.mulf %132, %133 : vector<2x256xf32>
    %cst_31 = arith.constant 1.000000e+00 : f32
    %135 = vector.broadcast %cst_31 : f32 to vector<2x256xf32>
    %136 = arith.subf %134, %135 : vector<2x256xf32>
    %137 = arith.select %11, %136, %132 : vector<2x256xi1>, vector<2x256xf32>
    %138 = vector.extract_strided_slice %137 {offsets = [0, 0], sizes = [2, 32], strides = [1, 1]} : vector<2x256xf32> to vector<2x32xf32>
    %139 = vector.extract_strided_slice %137 {offsets = [0, 32], sizes = [2, 32], strides = [1, 1]} : vector<2x256xf32> to vector<2x32xf32>
    %140 = vector.extract_strided_slice %137 {offsets = [0, 64], sizes = [2, 32], strides = [1, 1]} : vector<2x256xf32> to vector<2x32xf32>
    %141 = vector.extract_strided_slice %137 {offsets = [0, 96], sizes = [2, 32], strides = [1, 1]} : vector<2x256xf32> to vector<2x32xf32>
    %142 = arith.mulf %139, %106 : vector<2x32xf32>
    %143 = arith.mulf %138, %140 : vector<2x32xf32>
    %144 = arith.addf %142, %143 : vector<2x32xf32>
    %145 = math.tanh %144 : vector<2x32xf32>
    %146 = arith.mulf %141, %145 : vector<2x32xf32>
    %147 = arith.truncf %146 : vector<2x32xf32> to vector<2x32xbf16>
    %148 = vector.extract_strided_slice %137 {offsets = [0, 128], sizes = [2, 32], strides = [1, 1]} : vector<2x256xf32> to vector<2x32xf32>
    %149 = vector.extract_strided_slice %137 {offsets = [0, 160], sizes = [2, 32], strides = [1, 1]} : vector<2x256xf32> to vector<2x32xf32>
    %150 = vector.extract_strided_slice %137 {offsets = [0, 192], sizes = [2, 32], strides = [1, 1]} : vector<2x256xf32> to vector<2x32xf32>
    %151 = vector.extract_strided_slice %137 {offsets = [0, 224], sizes = [2, 32], strides = [1, 1]} : vector<2x256xf32> to vector<2x32xf32>
    %152 = arith.mulf %149, %116 : vector<2x32xf32>
    %153 = arith.mulf %148, %150 : vector<2x32xf32>
    %154 = arith.addf %152, %153 : vector<2x32xf32>
    %155 = math.tanh %154 : vector<2x32xf32>
    %156 = arith.mulf %151, %155 : vector<2x32xf32>
    %157 = arith.truncf %156 : vector<2x32xf32> to vector<2x32xbf16>
    %158 = vector.extract_strided_slice %17 {offsets = [8, 0], sizes = [2, 256], strides = [1, 1]} : vector<16x256xf32> to vector<2x256xf32>
    %cst_32 = arith.constant dense<0.000000e+00> : vector<2x256xf32>
    %159 = tpu.matmul %147, %18, %cst_32 {dimension_numbers = #tpu.dot_dimension_numbers<[1], [0], [0], [1], [0, 0, 1, 1], [], []>} : vector<2x32xbf16>, vector<32x256xbf16>, vector<2x256xf32> -> vector<2x256xf32>
    %160 = arith.addf %158, %159 : vector<2x256xf32>
    %cst_33 = arith.constant dense<0.000000e+00> : vector<2x256xf32>
    %161 = tpu.matmul %157, %19, %cst_33 {dimension_numbers = #tpu.dot_dimension_numbers<[1], [0], [0], [1], [0, 0, 1, 1], [], []>} : vector<2x32xbf16>, vector<32x256xbf16>, vector<2x256xf32> -> vector<2x256xf32>
    %162 = arith.addf %160, %161 : vector<2x256xf32>
    %cst_34 = arith.constant 2.000000e+00 : f32
    %163 = vector.broadcast %cst_34 : f32 to vector<2x256xf32>
    %164 = arith.mulf %162, %163 : vector<2x256xf32>
    %165 = arith.select %11, %164, %162 : vector<2x256xi1>, vector<2x256xf32>
    %166 = arith.negf %165 : vector<2x256xf32>
    %167 = math.exp %166 : vector<2x256xf32>
    %cst_35 = arith.constant 1.000000e+00 : f32
    %168 = vector.broadcast %cst_35 : f32 to vector<2x256xf32>
    %169 = arith.addf %168, %167 : vector<2x256xf32>
    %170 = arith.divf %168, %169 : vector<2x256xf32>
    %cst_36 = arith.constant 2.000000e+00 : f32
    %171 = vector.broadcast %cst_36 : f32 to vector<2x256xf32>
    %172 = arith.mulf %170, %171 : vector<2x256xf32>
    %cst_37 = arith.constant 1.000000e+00 : f32
    %173 = vector.broadcast %cst_37 : f32 to vector<2x256xf32>
    %174 = arith.subf %172, %173 : vector<2x256xf32>
    %175 = arith.select %11, %174, %170 : vector<2x256xi1>, vector<2x256xf32>
    %176 = vector.extract_strided_slice %175 {offsets = [0, 0], sizes = [2, 32], strides = [1, 1]} : vector<2x256xf32> to vector<2x32xf32>
    %177 = vector.extract_strided_slice %175 {offsets = [0, 32], sizes = [2, 32], strides = [1, 1]} : vector<2x256xf32> to vector<2x32xf32>
    %178 = vector.extract_strided_slice %175 {offsets = [0, 64], sizes = [2, 32], strides = [1, 1]} : vector<2x256xf32> to vector<2x32xf32>
    %179 = vector.extract_strided_slice %175 {offsets = [0, 96], sizes = [2, 32], strides = [1, 1]} : vector<2x256xf32> to vector<2x32xf32>
    %180 = arith.mulf %177, %144 : vector<2x32xf32>
    %181 = arith.mulf %176, %178 : vector<2x32xf32>
    %182 = arith.addf %180, %181 : vector<2x32xf32>
    %183 = math.tanh %182 : vector<2x32xf32>
    %184 = arith.mulf %179, %183 : vector<2x32xf32>
    %185 = arith.truncf %184 : vector<2x32xf32> to vector<2x32xbf16>
    %186 = vector.extract_strided_slice %175 {offsets = [0, 128], sizes = [2, 32], strides = [1, 1]} : vector<2x256xf32> to vector<2x32xf32>
    %187 = vector.extract_strided_slice %175 {offsets = [0, 160], sizes = [2, 32], strides = [1, 1]} : vector<2x256xf32> to vector<2x32xf32>
    %188 = vector.extract_strided_slice %175 {offsets = [0, 192], sizes = [2, 32], strides = [1, 1]} : vector<2x256xf32> to vector<2x32xf32>
    %189 = vector.extract_strided_slice %175 {offsets = [0, 224], sizes = [2, 32], strides = [1, 1]} : vector<2x256xf32> to vector<2x32xf32>
    %190 = arith.mulf %187, %154 : vector<2x32xf32>
    %191 = arith.mulf %186, %188 : vector<2x32xf32>
    %192 = arith.addf %190, %191 : vector<2x32xf32>
    %193 = math.tanh %192 : vector<2x32xf32>
    %194 = arith.mulf %189, %193 : vector<2x32xf32>
    %195 = arith.truncf %194 : vector<2x32xf32> to vector<2x32xbf16>
    %196 = vector.extract_strided_slice %17 {offsets = [10, 0], sizes = [2, 256], strides = [1, 1]} : vector<16x256xf32> to vector<2x256xf32>
    %cst_38 = arith.constant dense<0.000000e+00> : vector<2x256xf32>
    %197 = tpu.matmul %185, %18, %cst_38 {dimension_numbers = #tpu.dot_dimension_numbers<[1], [0], [0], [1], [0, 0, 1, 1], [], []>} : vector<2x32xbf16>, vector<32x256xbf16>, vector<2x256xf32> -> vector<2x256xf32>
    %198 = arith.addf %196, %197 : vector<2x256xf32>
    %cst_39 = arith.constant dense<0.000000e+00> : vector<2x256xf32>
    %199 = tpu.matmul %195, %19, %cst_39 {dimension_numbers = #tpu.dot_dimension_numbers<[1], [0], [0], [1], [0, 0, 1, 1], [], []>} : vector<2x32xbf16>, vector<32x256xbf16>, vector<2x256xf32> -> vector<2x256xf32>
    %200 = arith.addf %198, %199 : vector<2x256xf32>
    %cst_40 = arith.constant 2.000000e+00 : f32
    %201 = vector.broadcast %cst_40 : f32 to vector<2x256xf32>
    %202 = arith.mulf %200, %201 : vector<2x256xf32>
    %203 = arith.select %11, %202, %200 : vector<2x256xi1>, vector<2x256xf32>
    %204 = arith.negf %203 : vector<2x256xf32>
    %205 = math.exp %204 : vector<2x256xf32>
    %cst_41 = arith.constant 1.000000e+00 : f32
    %206 = vector.broadcast %cst_41 : f32 to vector<2x256xf32>
    %207 = arith.addf %206, %205 : vector<2x256xf32>
    %208 = arith.divf %206, %207 : vector<2x256xf32>
    %cst_42 = arith.constant 2.000000e+00 : f32
    %209 = vector.broadcast %cst_42 : f32 to vector<2x256xf32>
    %210 = arith.mulf %208, %209 : vector<2x256xf32>
    %cst_43 = arith.constant 1.000000e+00 : f32
    %211 = vector.broadcast %cst_43 : f32 to vector<2x256xf32>
    %212 = arith.subf %210, %211 : vector<2x256xf32>
    %213 = arith.select %11, %212, %208 : vector<2x256xi1>, vector<2x256xf32>
    %214 = vector.extract_strided_slice %213 {offsets = [0, 0], sizes = [2, 32], strides = [1, 1]} : vector<2x256xf32> to vector<2x32xf32>
    %215 = vector.extract_strided_slice %213 {offsets = [0, 32], sizes = [2, 32], strides = [1, 1]} : vector<2x256xf32> to vector<2x32xf32>
    %216 = vector.extract_strided_slice %213 {offsets = [0, 64], sizes = [2, 32], strides = [1, 1]} : vector<2x256xf32> to vector<2x32xf32>
    %217 = vector.extract_strided_slice %213 {offsets = [0, 96], sizes = [2, 32], strides = [1, 1]} : vector<2x256xf32> to vector<2x32xf32>
    %218 = arith.mulf %215, %182 : vector<2x32xf32>
    %219 = arith.mulf %214, %216 : vector<2x32xf32>
    %220 = arith.addf %218, %219 : vector<2x32xf32>
    %221 = math.tanh %220 : vector<2x32xf32>
    %222 = arith.mulf %217, %221 : vector<2x32xf32>
    %223 = arith.truncf %222 : vector<2x32xf32> to vector<2x32xbf16>
    %224 = vector.extract_strided_slice %213 {offsets = [0, 128], sizes = [2, 32], strides = [1, 1]} : vector<2x256xf32> to vector<2x32xf32>
    %225 = vector.extract_strided_slice %213 {offsets = [0, 160], sizes = [2, 32], strides = [1, 1]} : vector<2x256xf32> to vector<2x32xf32>
    %226 = vector.extract_strided_slice %213 {offsets = [0, 192], sizes = [2, 32], strides = [1, 1]} : vector<2x256xf32> to vector<2x32xf32>
    %227 = vector.extract_strided_slice %213 {offsets = [0, 224], sizes = [2, 32], strides = [1, 1]} : vector<2x256xf32> to vector<2x32xf32>
    %228 = arith.mulf %225, %192 : vector<2x32xf32>
    %229 = arith.mulf %224, %226 : vector<2x32xf32>
    %230 = arith.addf %228, %229 : vector<2x32xf32>
    %231 = math.tanh %230 : vector<2x32xf32>
    %232 = arith.mulf %227, %231 : vector<2x32xf32>
    %233 = arith.truncf %232 : vector<2x32xf32> to vector<2x32xbf16>
    %234 = vector.extract_strided_slice %17 {offsets = [12, 0], sizes = [2, 256], strides = [1, 1]} : vector<16x256xf32> to vector<2x256xf32>
    %cst_44 = arith.constant dense<0.000000e+00> : vector<2x256xf32>
    %235 = tpu.matmul %223, %18, %cst_44 {dimension_numbers = #tpu.dot_dimension_numbers<[1], [0], [0], [1], [0, 0, 1, 1], [], []>} : vector<2x32xbf16>, vector<32x256xbf16>, vector<2x256xf32> -> vector<2x256xf32>
    %236 = arith.addf %234, %235 : vector<2x256xf32>
    %cst_45 = arith.constant dense<0.000000e+00> : vector<2x256xf32>
    %237 = tpu.matmul %233, %19, %cst_45 {dimension_numbers = #tpu.dot_dimension_numbers<[1], [0], [0], [1], [0, 0, 1, 1], [], []>} : vector<2x32xbf16>, vector<32x256xbf16>, vector<2x256xf32> -> vector<2x256xf32>
    %238 = arith.addf %236, %237 : vector<2x256xf32>
    %cst_46 = arith.constant 2.000000e+00 : f32
    %239 = vector.broadcast %cst_46 : f32 to vector<2x256xf32>
    %240 = arith.mulf %238, %239 : vector<2x256xf32>
    %241 = arith.select %11, %240, %238 : vector<2x256xi1>, vector<2x256xf32>
    %242 = arith.negf %241 : vector<2x256xf32>
    %243 = math.exp %242 : vector<2x256xf32>
    %cst_47 = arith.constant 1.000000e+00 : f32
    %244 = vector.broadcast %cst_47 : f32 to vector<2x256xf32>
    %245 = arith.addf %244, %243 : vector<2x256xf32>
    %246 = arith.divf %244, %245 : vector<2x256xf32>
    %cst_48 = arith.constant 2.000000e+00 : f32
    %247 = vector.broadcast %cst_48 : f32 to vector<2x256xf32>
    %248 = arith.mulf %246, %247 : vector<2x256xf32>
    %cst_49 = arith.constant 1.000000e+00 : f32
    %249 = vector.broadcast %cst_49 : f32 to vector<2x256xf32>
    %250 = arith.subf %248, %249 : vector<2x256xf32>
    %251 = arith.select %11, %250, %246 : vector<2x256xi1>, vector<2x256xf32>
    %252 = vector.extract_strided_slice %251 {offsets = [0, 0], sizes = [2, 32], strides = [1, 1]} : vector<2x256xf32> to vector<2x32xf32>
    %253 = vector.extract_strided_slice %251 {offsets = [0, 32], sizes = [2, 32], strides = [1, 1]} : vector<2x256xf32> to vector<2x32xf32>
    %254 = vector.extract_strided_slice %251 {offsets = [0, 64], sizes = [2, 32], strides = [1, 1]} : vector<2x256xf32> to vector<2x32xf32>
    %255 = vector.extract_strided_slice %251 {offsets = [0, 96], sizes = [2, 32], strides = [1, 1]} : vector<2x256xf32> to vector<2x32xf32>
    %256 = arith.mulf %253, %220 : vector<2x32xf32>
    %257 = arith.mulf %252, %254 : vector<2x32xf32>
    %258 = arith.addf %256, %257 : vector<2x32xf32>
    %259 = math.tanh %258 : vector<2x32xf32>
    %260 = arith.mulf %255, %259 : vector<2x32xf32>
    %261 = arith.truncf %260 : vector<2x32xf32> to vector<2x32xbf16>
    %262 = vector.extract_strided_slice %251 {offsets = [0, 128], sizes = [2, 32], strides = [1, 1]} : vector<2x256xf32> to vector<2x32xf32>
    %263 = vector.extract_strided_slice %251 {offsets = [0, 160], sizes = [2, 32], strides = [1, 1]} : vector<2x256xf32> to vector<2x32xf32>
    %264 = vector.extract_strided_slice %251 {offsets = [0, 192], sizes = [2, 32], strides = [1, 1]} : vector<2x256xf32> to vector<2x32xf32>
    %265 = vector.extract_strided_slice %251 {offsets = [0, 224], sizes = [2, 32], strides = [1, 1]} : vector<2x256xf32> to vector<2x32xf32>
    %266 = arith.mulf %263, %230 : vector<2x32xf32>
    %267 = arith.mulf %262, %264 : vector<2x32xf32>
    %268 = arith.addf %266, %267 : vector<2x32xf32>
    %269 = math.tanh %268 : vector<2x32xf32>
    %270 = arith.mulf %265, %269 : vector<2x32xf32>
    %271 = arith.truncf %270 : vector<2x32xf32> to vector<2x32xbf16>
    %272 = vector.extract_strided_slice %17 {offsets = [14, 0], sizes = [2, 256], strides = [1, 1]} : vector<16x256xf32> to vector<2x256xf32>
    %cst_50 = arith.constant dense<0.000000e+00> : vector<2x256xf32>
    %273 = tpu.matmul %261, %18, %cst_50 {dimension_numbers = #tpu.dot_dimension_numbers<[1], [0], [0], [1], [0, 0, 1, 1], [], []>} : vector<2x32xbf16>, vector<32x256xbf16>, vector<2x256xf32> -> vector<2x256xf32>
    %274 = arith.addf %272, %273 : vector<2x256xf32>
    %cst_51 = arith.constant dense<0.000000e+00> : vector<2x256xf32>
    %275 = tpu.matmul %271, %19, %cst_51 {dimension_numbers = #tpu.dot_dimension_numbers<[1], [0], [0], [1], [0, 0, 1, 1], [], []>} : vector<2x32xbf16>, vector<32x256xbf16>, vector<2x256xf32> -> vector<2x256xf32>
    %276 = arith.addf %274, %275 : vector<2x256xf32>
    %cst_52 = arith.constant 2.000000e+00 : f32
    %277 = vector.broadcast %cst_52 : f32 to vector<2x256xf32>
    %278 = arith.mulf %276, %277 : vector<2x256xf32>
    %279 = arith.select %11, %278, %276 : vector<2x256xi1>, vector<2x256xf32>
    %280 = arith.negf %279 : vector<2x256xf32>
    %281 = math.exp %280 : vector<2x256xf32>
    %cst_53 = arith.constant 1.000000e+00 : f32
    %282 = vector.broadcast %cst_53 : f32 to vector<2x256xf32>
    %283 = arith.addf %282, %281 : vector<2x256xf32>
    %284 = arith.divf %282, %283 : vector<2x256xf32>
    %cst_54 = arith.constant 2.000000e+00 : f32
    %285 = vector.broadcast %cst_54 : f32 to vector<2x256xf32>
    %286 = arith.mulf %284, %285 : vector<2x256xf32>
    %cst_55 = arith.constant 1.000000e+00 : f32
    %287 = vector.broadcast %cst_55 : f32 to vector<2x256xf32>
    %288 = arith.subf %286, %287 : vector<2x256xf32>
    %289 = arith.select %11, %288, %284 : vector<2x256xi1>, vector<2x256xf32>
    %290 = vector.extract_strided_slice %289 {offsets = [0, 0], sizes = [2, 32], strides = [1, 1]} : vector<2x256xf32> to vector<2x32xf32>
    %291 = vector.extract_strided_slice %289 {offsets = [0, 32], sizes = [2, 32], strides = [1, 1]} : vector<2x256xf32> to vector<2x32xf32>
    %292 = vector.extract_strided_slice %289 {offsets = [0, 64], sizes = [2, 32], strides = [1, 1]} : vector<2x256xf32> to vector<2x32xf32>
    %293 = vector.extract_strided_slice %289 {offsets = [0, 96], sizes = [2, 32], strides = [1, 1]} : vector<2x256xf32> to vector<2x32xf32>
    %294 = arith.mulf %291, %258 : vector<2x32xf32>
    %295 = arith.mulf %290, %292 : vector<2x32xf32>
    %296 = arith.addf %294, %295 : vector<2x32xf32>
    %297 = math.tanh %296 : vector<2x32xf32>
    %298 = arith.mulf %293, %297 : vector<2x32xf32>
    %299 = arith.truncf %298 : vector<2x32xf32> to vector<2x32xbf16>
    %300 = vector.extract_strided_slice %289 {offsets = [0, 128], sizes = [2, 32], strides = [1, 1]} : vector<2x256xf32> to vector<2x32xf32>
    %301 = vector.extract_strided_slice %289 {offsets = [0, 160], sizes = [2, 32], strides = [1, 1]} : vector<2x256xf32> to vector<2x32xf32>
    %302 = vector.extract_strided_slice %289 {offsets = [0, 192], sizes = [2, 32], strides = [1, 1]} : vector<2x256xf32> to vector<2x32xf32>
    %303 = vector.extract_strided_slice %289 {offsets = [0, 224], sizes = [2, 32], strides = [1, 1]} : vector<2x256xf32> to vector<2x32xf32>
    %304 = arith.mulf %301, %268 : vector<2x32xf32>
    %305 = arith.mulf %300, %302 : vector<2x32xf32>
    %306 = arith.addf %304, %305 : vector<2x32xf32>
    %307 = math.tanh %306 : vector<2x32xf32>
    %308 = arith.mulf %303, %307 : vector<2x32xf32>
    %309 = arith.truncf %308 : vector<2x32xf32> to vector<2x32xbf16>
    %310 = vector.extract_strided_slice %17 {offsets = [14, 0], sizes = [2, 256], strides = [1, 1]} : vector<16x256xf32> to vector<2x256xf32>
    %cst_56 = arith.constant dense<0.000000e+00> : vector<2x256xf32>
    %311 = tpu.matmul %299, %18, %cst_56 {dimension_numbers = #tpu.dot_dimension_numbers<[1], [0], [0], [1], [0, 0, 1, 1], [], []>} : vector<2x32xbf16>, vector<32x256xbf16>, vector<2x256xf32> -> vector<2x256xf32>
    %312 = arith.addf %310, %311 : vector<2x256xf32>
    %cst_57 = arith.constant dense<0.000000e+00> : vector<2x256xf32>
    %313 = tpu.matmul %309, %19, %cst_57 {dimension_numbers = #tpu.dot_dimension_numbers<[1], [0], [0], [1], [0, 0, 1, 1], [], []>} : vector<2x32xbf16>, vector<32x256xbf16>, vector<2x256xf32> -> vector<2x256xf32>
    %314 = arith.addf %312, %313 : vector<2x256xf32>
    %cst_58 = arith.constant 2.000000e+00 : f32
    %315 = vector.broadcast %cst_58 : f32 to vector<2x256xf32>
    %316 = arith.mulf %314, %315 : vector<2x256xf32>
    %317 = arith.select %11, %316, %314 : vector<2x256xi1>, vector<2x256xf32>
    %318 = arith.negf %317 : vector<2x256xf32>
    %319 = math.exp %318 : vector<2x256xf32>
    %cst_59 = arith.constant 1.000000e+00 : f32
    %320 = vector.broadcast %cst_59 : f32 to vector<2x256xf32>
    %321 = arith.addf %320, %319 : vector<2x256xf32>
    %322 = arith.divf %320, %321 : vector<2x256xf32>
    %cst_60 = arith.constant 2.000000e+00 : f32
    %323 = vector.broadcast %cst_60 : f32 to vector<2x256xf32>
    %324 = arith.mulf %322, %323 : vector<2x256xf32>
    %cst_61 = arith.constant 1.000000e+00 : f32
    %325 = vector.broadcast %cst_61 : f32 to vector<2x256xf32>
    %326 = arith.subf %324, %325 : vector<2x256xf32>
    %327 = arith.select %11, %326, %322 : vector<2x256xi1>, vector<2x256xf32>
    %328 = vector.extract_strided_slice %327 {offsets = [0, 128], sizes = [2, 32], strides = [1, 1]} : vector<2x256xf32> to vector<2x32xf32>
    %329 = vector.extract_strided_slice %327 {offsets = [0, 160], sizes = [2, 32], strides = [1, 1]} : vector<2x256xf32> to vector<2x32xf32>
    %330 = vector.extract_strided_slice %327 {offsets = [0, 192], sizes = [2, 32], strides = [1, 1]} : vector<2x256xf32> to vector<2x32xf32>
    %331 = vector.extract_strided_slice %327 {offsets = [0, 224], sizes = [2, 32], strides = [1, 1]} : vector<2x256xf32> to vector<2x32xf32>
    %332 = arith.mulf %329, %306 : vector<2x32xf32>
    %333 = arith.mulf %328, %330 : vector<2x32xf32>
    %334 = arith.addf %332, %333 : vector<2x32xf32>
    %335 = math.tanh %334 : vector<2x32xf32>
    %336 = arith.mulf %331, %335 : vector<2x32xf32>
    %337 = arith.truncf %336 : vector<2x32xf32> to vector<2x32xbf16>
    %c0_62 = arith.constant 0 : index
    %c0_63 = arith.constant 0 : index
    %338 = vector.load %arg5[%c0_62, %c0_63] : memref<32x32xbf16, #tpu.memory_space<vmem>>, vector<32x32xbf16>
    %cst_64 = arith.constant dense<0.000000e+00> : vector<2x32xf32>
    %339 = tpu.matmul %337, %338, %cst_64 {dimension_numbers = #tpu.dot_dimension_numbers<[1], [0], [0], [1], [0, 0, 1, 1], [], []>} : vector<2x32xbf16>, vector<32x32xbf16>, vector<2x32xf32> -> vector<2x32xf32>
    %c0_65 = arith.constant 0 : index
    %c0_66 = arith.constant 0 : index
    %340 = vector.load %arg6[%c0_65, %c0_66] : memref<1x32xf32, #tpu.memory_space<vmem>>, vector<1x32xf32>
    %341 = vector.broadcast %340 : vector<1x32xf32> to vector<2x32xf32>
    %342 = arith.addf %339, %341 : vector<2x32xf32>
    %cst_67 = arith.constant 0.000000e+00 : f32
    %343 = vector.broadcast %cst_67 : f32 to vector<2x32xf32>
    %344 = arith.maximumf %342, %343 : vector<2x32xf32>
    %345 = arith.truncf %344 : vector<2x32xf32> to vector<2x32xbf16>
    %c0_68 = arith.constant 0 : index
    %c0_69 = arith.constant 0 : index
    %346 = vector.load %arg7[%c0_68, %c0_69] : memref<32x16xbf16, #tpu.memory_space<vmem>>, vector<32x16xbf16>
    %cst_70 = arith.constant dense<0.000000e+00> : vector<2x16xf32>
    %347 = tpu.matmul %345, %346, %cst_70 {dimension_numbers = #tpu.dot_dimension_numbers<[1], [0], [0], [1], [0, 0, 1, 1], [], []>} : vector<2x32xbf16>, vector<32x16xbf16>, vector<2x16xf32> -> vector<2x16xf32>
    %c0_71 = arith.constant 0 : index
    %c0_72 = arith.constant 0 : index
    %348 = vector.load %arg8[%c0_71, %c0_72] : memref<1x16xf32, #tpu.memory_space<vmem>>, vector<1x16xf32>
    %349 = vector.broadcast %348 : vector<1x16xf32> to vector<2x16xf32>
    %350 = arith.addf %347, %349 : vector<2x16xf32>
    %cst_73 = arith.constant 0.000000e+00 : f32
    %351 = vector.broadcast %cst_73 : f32 to vector<2x16xf32>
    %352 = arith.maximumf %350, %351 : vector<2x16xf32>
    %353 = arith.truncf %352 : vector<2x16xf32> to vector<2x16xbf16>
    %c0_74 = arith.constant 0 : index
    %c0_75 = arith.constant 0 : index
    %354 = vector.load %arg9[%c0_74, %c0_75] : memref<16x5xbf16, #tpu.memory_space<vmem>>, vector<16x5xbf16>
    %cst_76 = arith.constant dense<0.000000e+00> : vector<2x5xf32>
    %355 = tpu.matmul %353, %354, %cst_76 {dimension_numbers = #tpu.dot_dimension_numbers<[1], [0], [0], [1], [0, 0, 1, 1], [], []>} : vector<2x16xbf16>, vector<16x5xbf16>, vector<2x5xf32> -> vector<2x5xf32>
    %c0_77 = arith.constant 0 : index
    %c0_78 = arith.constant 0 : index
    %356 = vector.load %arg10[%c0_77, %c0_78] : memref<1x5xf32, #tpu.memory_space<vmem>>, vector<1x5xf32>
    %357 = vector.broadcast %356 : vector<1x5xf32> to vector<2x5xf32>
    %358 = arith.addf %355, %357 : vector<2x5xf32>
    %c0_79 = arith.constant 0 : index
    %c0_80 = arith.constant 0 : index
    %359 = vector.load %arg11[%c0_79, %c0_80] : memref<2x5xf32, #tpu.memory_space<vmem>>, vector<2x5xf32>
    tpu.vector_store %arg11[%c0_79, %c0_80], %358 {strides = array<i32>} : memref<2x5xf32, #tpu.memory_space<vmem>>, vector<2x5xf32>,
    return
  }
}

</mosaic_0001>

<bundles_post_ra>
// kernel: tpu_custom_call.1
= control target key start
LH: loop header
LB: loop body
LE: loop exit
PB: predicated region body
PF: predicated region fallthrough
CT: control target
= control target key end

     0   :  { %16 = vsyncpa [#allocation3], 0  ;;  %s2569_s0 = inlined_call_operand.vmem [shape: bf16[16,4], index: 0, kind: input, shape index: {}]   ;;  %s2570_s1 = inlined_call_operand.hbm [shape: bf16[4,256], index: 1, kind: input, shape index: {}]   ;;  %s2571_s2 = inlined_call_operand.hbm [shape: f32[1,256], index: 2, kind: input, shape index: {}]   ;;  %s2572_s3 = inlined_call_operand.vmem [shape: bf16[32,256], index: 3, kind: input, shape index: {}]   ;;  %s2573_s4 = inlined_call_operand.hbm [shape: bf16[32,256], index: 4, kind: input, shape index: {}]   ;;  %s2574_s5 = inlined_call_operand.vmem [shape: bf16[32,32], index: 5, kind: input, shape index: {}]   ;;  %s2575_s6 = inlined_call_operand.vmem [shape: f32[1,32], index: 6, kind: input, shape index: {}]   ;;  %s2576_s7 = inlined_call_operand.vmem [shape: bf16[32,16], index: 7, kind: input, shape index: {}]   ;;  %s2577_s8 = inlined_call_operand.vmem [shape: f32[1,16], index: 8, kind: input, shape index: {}]   ;;  %s2578_s9 = inlined_call_operand.vmem [shape: bf16[16,5], index: 9, kind: input, shape index: {}]   ;;  %s2579_s10 = inlined_call_operand.vmem [shape: f32[1,5], index: 10, kind: input, shape index: {}]   ;;  %s2580_s11 = inlined_call_operand.hbm [shape: f32[2,5], index: 11, kind: output, shape index: {}]  }
   0x1   :  { %17 = vsyncpa [#allocation6], 0 }
   0x2   :  { %18 = vsyncpa [#allocation4], 0  ;;  %s2086_s17 = smov [#allocation5]   ;;  %s2087_s19 = smov [#allocation2]  }
   0x3   :  { %s37_s18 = sshll.u32 %s2086_s17, 4  ;;  %s27_s20 = sshll.u32 %s2087_s19, 4  ;;  %s38_s18 = int_to_ptr.vmem [resolvable:$true] %s37_s18  ;;  %s28_s20 = int_to_ptr.vmem [resolvable:$true] %s27_s20 }
   0x4   :  { %s1992_s23 = scalar_lea.hbm %s2571_s2, 32 }
   0x5   :  { %p1993_p0 = scmp.ne.s32.totalorder %s2571_s2, %s1992_s23  ;;  %p1996_p1 = scmp.lt.u32.totalorder %s1992_s23, %s2571_s2 }
   0x7   :  { %p1998_p2 = pnand %p1996_p1, %p1993_p0 }
   0x9   :  { %2001 = shalt.err (!%p1998_p2)
}
   0xa   :  { %s2002_s28 = scalar_lea.vmem %s38_s18, 32  ;;  %p2007_p4 = scmp.lt.s32.totalorder %s38_s18, %s38_s18 }
   0xb   :  { %p2003_p3 = scmp.ne.s32.totalorder %s38_s18, %s2002_s28  ;;  %p2008_p5 = scmp.lt.s32.totalorder %s2002_s28, %s2002_s28 }
   0xd   :  { %p2009_p6 = por %p2008_p5, %p2007_p4 }
   0xf   :  { %p2010_p7 = pnand %p2009_p6, %p2003_p3 }
  0x11   :  { %2013 = shalt.err (!%p2010_p7)
}
  0x12   :  { %40 = dma.hbm_to_vmem [thread:$0]  %s2571_s2, 32, %s38_s18, [#allocation6]  }
  0x13   :  { %s2014_s14 = scalar_lea.hbm %s2570_s1, 64 }
  0x14   :  { %p2015_p8 = scmp.ne.s32.totalorder %s2570_s1, %s2014_s14  ;;  %p2018_p9 = scmp.lt.u32.totalorder %s2014_s14, %s2570_s1 }
  0x16   :  { %p2020_p10 = pnand %p2018_p9, %p2015_p8 }
  0x18   :  { %2023 = shalt.err (!%p2020_p10)
}
  0x19   :  { %s2024_s21 = scalar_lea.vmem %s28_s20, 64  ;;  %p2029_p12 = scmp.lt.s32.totalorder %s28_s20, %s28_s20 }
  0x1a   :  { %p2025_p11 = scmp.ne.s32.totalorder %s28_s20, %s2024_s21  ;;  %p2030_p13 = scmp.lt.s32.totalorder %s2024_s21, %s2024_s21 }
  0x1c   :  { %p2031_p0 = por %p2030_p13, %p2029_p12 }
  0x1e   :  { %p2032_p1 = pnand %p2031_p0, %p2025_p11 }
  0x20   :  { %2035 = shalt.err (!%p2032_p1)
}
  0x21   :  { %30 = dma.hbm_to_vmem [thread:$0]  %s2570_s1, 64, %s28_s20, [#allocation3]  }
  0x22   :  { %s2088_s22 = smov [#allocation7]   ;;  %s2036_s26 = scalar_lea.hbm %s2573_s4, 512 }
  0x23   :  { %s48_s23 = sshll.u32 %s2088_s22, 4  ;;  %p2037_p2 = scmp.ne.s32.totalorder %s2573_s4, %s2036_s26  ;;  %s49_s23 = int_to_ptr.vmem [resolvable:$true] %s48_s23 }
  0x24   :  { %p2040_p3 = scmp.lt.u32.totalorder %s2036_s26, %s2573_s4 }
  0x26   :  { %p2042_p4 = pnand %p2040_p3, %p2037_p2 }
  0x28   :  { %2045 = shalt.err (!%p2042_p4)
}
  0x29   :  { %s2046_s12 = scalar_lea.vmem %s49_s23, 512  ;;  %p2051_p6 = scmp.lt.s32.totalorder %s49_s23, %s49_s23 }
  0x2a   :  { %p2047_p5 = scmp.ne.s32.totalorder %s49_s23, %s2046_s12  ;;  %p2052_p7 = scmp.lt.s32.totalorder %s2046_s12, %s2046_s12 }
  0x2c   :  { %p2053_p8 = por %p2052_p7, %p2051_p6 }
  0x2e   :  { %p2054_p9 = pnand %p2053_p8, %p2047_p5 }
  0x30   :  { %2057 = shalt.err (!%p2054_p9)
}
  0x31   :  { %s2089_s1 = smov 128   ;;  %s2090_s20 = smov 8  }
  0x32   :  { %54 = dma.hbm_to_vmem [thread:$0]  %s2573_s4, 512, %s49_s23, [#allocation6], %s2089_s1, %s2089_s1, %s2090_s20  }
  0x33   :  { %2080 = dma.done.wait [#allocation3], 64  }
  0x34   :  { %2081 = vsyncadd [#allocation3], 4294967232 }
  0x35   :  { %2082 = dma.done.wait [#allocation6], 544  }
  0x36   :  { %2083 = vsyncadd [#allocation6], 4294966752  ;;  %v2091_v0 = vmov 0   ;;  %vm127_vm0 = vcmask 1041408   ;;  %v1878_v4 = vld [vmem:[%s2569_s0] sm:$0xff]   ;;  %vm123_vm1 = vcmask 31744   ;;  %v77_v5 = vlaneseq }
  0x37   :  { %166 = vmatprep.mubr.bf16.mxu0 %v2091_v0  ;;  %273 = vmatprep.mubr.bf16.mxu1 %v2091_v0  ;;  %v1762_v1 = vld.sshfl [vmem:[#allocation2] sm:$0x33 pattern:$0x76325410]  ;;  %v97_v8 = vld [vmem:[#allocation5] sm:$0x3] }
  0x38   :  { %v122_v2 = vcombine.high %v1762_v1, %v1762_v1  ;;  %v129_v3 = vsel %vm127_vm0, %v1762_v1, 0  ;;  %v100_v6 = vshrl.u32 %v77_v5, 7  ;;  %v78_v9 = vand.u32 127, %v77_v5  ;;  %s2092_s0 = smov 64   ;;  %s2093_s4 = smov 32   ;;  %v1892_v54 = vld [vmem:[%s2574_s5 + $0x8] sm:$0xff]  }
  0x39   :  { %v2223_v35 = vld [vmem:[%s2572_s3 + $0x4] ss:$8 sps:$4 sm:$0xff]   ;;  %v2228_v36 = vld [vmem:[%s2572_s3] ss:$8 sps:$4 sm:$0xff]   ;;  %v2233_v37 = vld [vmem:[%s2572_s3 + $0x14] ss:$8 sps:$4 sm:$0xff]  }
  0x3a   :  { %1763 = vmatprep.subr.msk.bf16.mxu0 %vm127_vm0, %v122_v2  ;;  %v101_v7 = vsub.s32 0, %v100_v6  ;;  %v105_v11 = vsub.s32 1, %v100_v6  ;;  %vm80_vm2 = vcmp.ge.s32.totalorder %v78_v9, 64  ;;  %vm82_vm3 = vcmp.lt.s32.totalorder %v78_v9, 96  ;;  %241 = vmatprep.subr.bf16.mxu1 %v2223_v35  ;;  %v2241_v38 = vld [vmem:[%s2572_s3 + $0x10] ss:$8 sps:$4 sm:$0xff]  }
  0x3b   :  { %135 = vmatpush1.bf16.msra.mxu0 %v129_v3  ;;  %vm2201_vm4 = vmand %vm80_vm2, %vm82_vm3  ;;  %242 = vmatpush1.bf16.msra.mxu1 %v2228_v36  ;;  %vm237_vm5 = vcmask 261120   ;;  %v79_v44 = vadd.s32 128, %v78_v9  ;;  %vm2095_vm9 = vmmov 0   ;;  %vm1699_vm10 = vcmask 130048   ;;  %s2096_s15 = smov [#allocation8]  }
  0x3c   :  { %v102_v10 = vrot.slane %v97_v8, %v101_v7  ;;  %v106_v16 = vrot.slane %v97_v8, %v105_v11  ;;  %358 = vmatprep.subr.bf16.mxu0 %v2223_v35  ;;  %243 = vmatprep.subr.bf16.mxu1 %v2233_v37  ;;  %s1751_s16 = sshll.u32 %s2096_s15, 4  ;;  %vm1743_vm11 = vcmask 33792   ;;  %s1752_s16 = int_to_ptr.vmem [resolvable:$true] %s1751_s16 }
  0x3d   :  { %vm87_vm6 = vcmp.ge.s32.totalorder %v79_v44, 192  ;;  %vm89_vm7 = vcmp.lt.s32.totalorder %v79_v44, 224  ;;  %p2063_p11 = scmp.lt.s32.totalorder %s1752_s16, %s1752_s16 }
  0x3e   :  { %1764 = vmatmul.mubr.msk.bf16.vlgmr.msra.gmra.mrb[0].mxu0 %vm123_vm1, %v1878_v4  ;;  %vm2257_vm8 = vmand %vm87_vm6, %vm89_vm7 }
  0x3f   :  { %390 = vmatprep.mubr.bf16.mxu0 %v2091_v0  ;;  %359 = vmatpush1.bf16.msra.mxu0 %v2228_v36 }
  0x40   :  { %360 = vmatprep.subr.bf16.mxu0 %v2233_v37  ;;  %244 = vmatpush1.bf16.msra.mxu1 %v2241_v38 }
  0x43   :  { %361 = vmatpush1.bf16.msra.mxu0 %v2241_v38 }
  0x44   :  { %554 = vmatprep.subr.bf16.mxu0 %v2223_v35 }
 0x111   :  { %v168_v12 = vpop.f32.mrb[0].mxu0 }
 0x112   :  { %v2199_v13 = vadd.f32 %v168_v12, %v102_v10  ;;  %v170_v14 = vpop.f32.mrb[1].mxu0 }
 0x113   :  { %v172_v17 = vpop.f32.mrb[2].mxu0  ;;  %v2253_v48 = vadd.f32 %v170_v14, %v106_v16 }
 0x114   :  { %v185_v18 = vmul.f32 2.0, %v2199_v13  ;;  %v2206_v19 = vadd.f32 %v172_v17, %v102_v10  ;;  %v174_v20 = vpop.f32.mrb[3].mxu0 }
 0x115   :  { %v2208_v21 = vadd.f32 %v174_v20, %v106_v16 }
 0x116   :  { %v186_v22 = vsel %vm2201_vm4, %v185_v18, %v2199_v13 }
 0x117   :  { %v1765_v23 = vmul.f32 -1.442695, %v186_v22 }
 0x119   :  { %1896 = vpow2.f32 %v1765_v23 }
 0x123   :  { %v1897_v24 = vpop.eup %1896 }
 0x124   :  { %v190_v25 = vadd.f32 1.0, %v1897_v24 }
 0x126   :  { %1898 = vrcp.f32 %v190_v25  ;;  %v2280_v25 = vld [vmem:[#allocation7 + $0x4] ss:$8 sps:$4 sm:$0xff]  }
 0x127   :  { %434 = vmatprep.subr.bf16.mxu1 %v2280_v25 }
 0x130   :  { %v1899_v26 = vpop.eup %1898 }
 0x131   :  { %v193_v27 = vmul.f32 2.0, %v1899_v26 }
 0x133   :  { %v1766_v28 = vadd.f32 -1.0, %v193_v27  ;;  %v2284_v27 = vld [vmem:[#allocation7 + $0x14] ss:$8 sps:$4 sm:$0xff]  }
 0x135   :  { %v195_v29 = vsel %vm2201_vm4, %v1766_v28, %v1899_v26  ;;  %v2282_v26 = vld [vmem:[#allocation7] ss:$8 sps:$4 sm:$0xff]   ;;  %v2288_v28 = vld [vmem:[#allocation7 + $0x10] ss:$8 sps:$4 sm:$0xff]  }
 0x136   :  { %198 = vrot.lane.b32.xlu0 %v195_v29, %s2092_s0  ;;  %v196_v32 = vmul.f32 0.0, %v195_v29 }
 0x1a8   :  { %v199_v30 = vpop.permute.xlu0 %198 }
 0x1a9   :  { %v201_v31 = vmul.f32 %v199_v30, %v195_v29 }
 0x1ab   :  { %203 = vrot.lane.b32.xlu0 %v201_v31, %s2093_s4 }
 0x21d   :  { %v204_v33 = vpop.permute.xlu0 %203 }
 0x21e   :  { %v2217_v34 = vadd.f32 %v204_v33, %v196_v32 }
 0x220   :  { %1900 = vtanh.f32 %v2217_v34  ;;  %v313_v16 = vrot.slane %v2217_v34, 6 }
 0x22a   :  { %v1901_v39 = vpop.eup %1900 }
 0x22b   :  { %209 = vrot.lane.b32.xlu1 %v1901_v39, %s2092_s0 }
 0x29d   :  { %v210_v40 = vpop.permute.xlu1 %209 }
 0x29e   :  { %v212_v41 = vmul.f32 %v210_v40, %v195_v29 }
 0x2a0   :  { %v213_v42 = vpack.c.bf16 %v212_v41, %v212_v41 }
 0x2a2   :  { %215 = vrot.lane.b32.xlu1 %v213_v42, %s2093_s4 }
 0x314   :  { %v216_v43 = vpop.permute.xlu1 %215 }
 0x315   :  { %1771 = vmatmul.mubr.msk.bf16.vlgmr.msra.gmra.mrb[0].mxu1 %vm237_vm5, %v216_v43 }
 0x316   :  { %466 = vmatprep.mubr.bf16.mxu1 %v2091_v0  ;;  %435 = vmatpush1.bf16.msra.mxu1 %v2282_v26 }
 0x317   :  { %436 = vmatprep.subr.bf16.mxu1 %v2284_v27 }
 0x31a   :  { %437 = vmatpush1.bf16.msra.mxu1 %v2288_v28 }
 0x31b   :  { %610 = vmatprep.subr.bf16.mxu1 %v2280_v25 }
 0x3e8   :  { %v275_v45 = vpop.f32.mrb[0].mxu1 }
 0x3e9   :  { %v284_v46 = vrot.slane %v275_v45, 6  ;;  %v277_v47 = vpop.f32.mrb[1].mxu1 }
 0x3ea   :  { %v285_v49 = vrot.slane %v277_v47, 6  ;;  %v279_v50 = vpop.f32.mrb[2].mxu1 }
 0x3eb   :  { %v288_v51 = vadd.f32 %v284_v46, %v2199_v13  ;;  %v280_v52 = vpop.f32.mrb[3].mxu1 }
 0x3ec   :  { %v289_v53 = vadd.f32 %v285_v49, %v2253_v48 }
 0x3ed   :  { %v290_v55 = vmul.f32 2.0, %v288_v51 }
 0x3ee   :  { %v291_v56 = vmul.f32 2.0, %v289_v53 }
 0x3ef   :  { %v292_v57 = vsel %vm2201_vm4, %v290_v55, %v288_v51 }
 0x3f0   :  { %v1772_v58 = vmul.f32 -1.442695, %v292_v57  ;;  %v293_v59 = vsel %vm2257_vm8, %v291_v56, %v289_v53 }
 0x3f1   :  { %v1773_v60 = vmul.f32 -1.442695, %v293_v59 }
 0x3f2   :  { %1902 = vpow2.f32 %v1772_v58 }
 0x3f3   :  { %1904 = vpow2.f32 %v1773_v60 }
 0x3fc   :  { %v1903_v61 = vpop.eup %1902 }
 0x3fd   :  { %v1905_v62 = vpop.eup %1904  ;;  %v300_v63 = vadd.f32 1.0, %v1903_v61 }
 0x3fe   :  { %v301_v1 = vadd.f32 1.0, %v1905_v62 }
 0x3ff   :  { %1906 = vrcp.f32 %v300_v63 }
 0x400   :  { %1908 = vrcp.f32 %v301_v1 }
 0x409   :  { %v1907_v2 = vpop.eup %1906 }
 0x40a   :  { %v1909_v3 = vpop.eup %1908  ;;  %v306_v4 = vmul.f32 2.0, %v1907_v2 }
 0x40b   :  { %v307_v5 = vmul.f32 2.0, %v1909_v3 }
 0x40c   :  { %v1774_v6 = vadd.f32 -1.0, %v306_v4 }
 0x40d   :  { %v1775_v7 = vadd.f32 -1.0, %v307_v5 }
 0x40e   :  { %v310_v8 = vsel %vm2201_vm4, %v1774_v6, %v1907_v2 }
 0x40f   :  { %317 = vrot.lane.b32.xlu0 %v310_v8, %s2092_s0  ;;  %v311_v9 = vsel %vm2257_vm8, %v1775_v7, %v1909_v3  ;;  %v315_v17 = vmul.f32 %v313_v16, %v310_v8 }
 0x410   :  { %335 = vrot.lane.b32.xlu1 %v311_v9, %s2092_s0  ;;  %v333_v20 = vmul.f32 0.0, %v311_v9 }
 0x481   :  { %v318_v10 = vpop.permute.xlu0 %317 }
 0x482   :  { %v320_v11 = vmul.f32 %v318_v10, %v310_v8  ;;  %v336_v12 = vpop.permute.xlu1 %335 }
 0x483   :  { %v338_v14 = vmul.f32 %v336_v12, %v311_v9 }
 0x484   :  { %322 = vrot.lane.b32.xlu0 %v320_v11, %s2093_s4 }
 0x485   :  { %340 = vrot.lane.b32.xlu1 %v338_v14, %s2093_s4 }
 0x4f6   :  { %v323_v18 = vpop.permute.xlu0 %322 }
 0x4f7   :  { %v2274_v22 = vadd.f32 %v323_v18, %v315_v17  ;;  %v341_v23 = vpop.permute.xlu1 %340 }
 0x4f8   :  { %v2276_v24 = vadd.f32 %v341_v23, %v333_v20 }
 0x4f9   :  { %1910 = vtanh.f32 %v2274_v22 }
 0x4fa   :  { %1912 = vtanh.f32 %v2276_v24 }
 0x503   :  { %v1911_v29 = vpop.eup %1910 }
 0x504   :  { %v1913_v30 = vpop.eup %1912  ;;  %328 = vrot.lane.b32.xlu0 %v1911_v29, %s2092_s0 }
 0x505   :  { %346 = vrot.lane.b32.xlu1 %v1913_v30, %s2092_s0 }
 0x576   :  { %v329_v31 = vpop.permute.xlu0 %328 }
 0x577   :  { %v331_v32 = vmul.f32 %v329_v31, %v310_v8  ;;  %v347_v33 = vpop.permute.xlu1 %346 }
 0x578   :  { %v349_v34 = vmul.f32 %v347_v33, %v311_v9  ;;  %v527_v33 = vrot.slane %v2276_v24, 6 }
 0x579   :  { %v332_v39 = vpack.c.bf16 %v331_v32, %v331_v32  ;;  %v506_v32 = vrot.slane %v2274_v22, 6 }
 0x57a   :  { %v350_v40 = vpack.c.bf16 %v349_v34, %v349_v34 }
 0x57b   :  { %v352_v41 = vrot.slane %v332_v39, 1 }
 0x57c   :  { %v408_v42 = vrot.slane %v350_v40, 1 }
 0x57d   :  { %353 = vrot.lane.b32.xlu0 %v352_v41, %s2093_s4 }
 0x57e   :  { %409 = vrot.lane.b32.xlu1 %v408_v42, %s2093_s4 }
 0x5ef   :  { %v354_v43 = vpop.permute.xlu0 %353 }
 0x5f0   :  { %1776 = vmatmul.mubr.msk.bf16.vlgmr.msra.gmra.mrb[4].mxu0 %vm237_vm5, %v354_v43  ;;  %v410_v44 = vpop.permute.xlu1 %409 }
 0x5f1   :  { %1781 = vmatmul.mubr.msk.bf16.vlgmr.msra.gmra.mrb[4].mxu1 %vm237_vm5, %v410_v44  ;;  %555 = vmatpush1.bf16.msra.mxu0 %v2228_v36 }
 0x5f2   :  { %611 = vmatpush1.bf16.msra.mxu1 %v2282_v26  ;;  %556 = vmatprep.subr.bf16.mxu0 %v2233_v37 }
 0x5f3   :  { %612 = vmatprep.subr.bf16.mxu1 %v2284_v27  ;;  %586 = vmatprep.mubr.bf16.mxu0 %v2091_v0 }
 0x5f4   :  { %642 = vmatprep.mubr.bf16.mxu1 %v2091_v0 }
 0x5f5   :  { %557 = vmatpush1.bf16.msra.mxu0 %v2241_v38 }
 0x5f6   :  { %613 = vmatpush1.bf16.msra.mxu1 %v2288_v28  ;;  %730 = vmatprep.subr.bf16.mxu0 %v2223_v35 }
 0x5f7   :  { %893 = vmatprep.subr.bf16.mxu1 %v2223_v35 }
 0x6c3   :  { %v392_v45 = vpop.f32.mrb[4].mxu0 }
 0x6c4   :  { %v401_v46 = vrot.slane %v392_v45, 4  ;;  %v394_v47 = vpop.f32.mrb[5].mxu0  ;;  %v468_v49 = vpop.f32.mrb[4].mxu1 }
 0x6c5   :  { %v402_v50 = vrot.slane %v394_v47, 4  ;;  %v477_v51 = vrot.slane %v468_v49, 4  ;;  %v396_v52 = vpop.f32.mrb[6].mxu0  ;;  %v470_v53 = vpop.f32.mrb[5].mxu1 }
 0x6c6   :  { %v405_v55 = vadd.f32 %v401_v46, %v2199_v13  ;;  %v478_v56 = vrot.slane %v470_v53, 4  ;;  %v397_v57 = vpop.f32.mrb[7].mxu0  ;;  %v472_v58 = vpop.f32.mrb[6].mxu1 }
 0x6c7   :  { %v406_v59 = vadd.f32 %v402_v50, %v2253_v48  ;;  %v473_v60 = vpop.f32.mrb[7].mxu1 }
 0x6c8   :  { %v481_v61 = vadd.f32 %v477_v51, %v405_v55 }
 0x6c9   :  { %v482_v62 = vadd.f32 %v478_v56, %v406_v59 }
 0x6ca   :  { %v483_v63 = vmul.f32 2.0, %v481_v61 }
 0x6cb   :  { %v484_v1 = vmul.f32 2.0, %v482_v62 }
 0x6cc   :  { %v485_v2 = vsel %vm2201_vm4, %v483_v63, %v481_v61 }
 0x6cd   :  { %v1782_v3 = vmul.f32 -1.442695, %v485_v2  ;;  %v486_v4 = vsel %vm2257_vm8, %v484_v1, %v482_v62 }
 0x6ce   :  { %v1783_v5 = vmul.f32 -1.442695, %v486_v4 }
 0x6cf   :  { %1914 = vpow2.f32 %v1782_v3 }
 0x6d0   :  { %1916 = vpow2.f32 %v1783_v5 }
 0x6d9   :  { %v1915_v6 = vpop.eup %1914 }
 0x6da   :  { %v1917_v7 = vpop.eup %1916  ;;  %v493_v8 = vadd.f32 1.0, %v1915_v6 }
 0x6db   :  { %v494_v9 = vadd.f32 1.0, %v1917_v7 }
 0x6dc   :  { %1918 = vrcp.f32 %v493_v8 }
 0x6dd   :  { %1920 = vrcp.f32 %v494_v9 }
 0x6e6   :  { %v1919_v10 = vpop.eup %1918 }
 0x6e7   :  { %v1921_v11 = vpop.eup %1920  ;;  %v499_v12 = vmul.f32 2.0, %v1919_v10 }
 0x6e8   :  { %v500_v14 = vmul.f32 2.0, %v1921_v11 }
 0x6e9   :  { %v1784_v16 = vadd.f32 -1.0, %v499_v12 }
 0x6ea   :  { %v1785_v17 = vadd.f32 -1.0, %v500_v14 }
 0x6eb   :  { %v503_v18 = vsel %vm2201_vm4, %v1784_v16, %v1919_v10 }
 0x6ec   :  { %510 = vrot.lane.b32.xlu0 %v503_v18, %s2092_s0  ;;  %v504_v20 = vsel %vm2257_vm8, %v1785_v17, %v1921_v11  ;;  %v508_v34 = vmul.f32 %v506_v32, %v503_v18 }
 0x6ed   :  { %531 = vrot.lane.b32.xlu1 %v504_v20, %s2092_s0  ;;  %v529_v40 = vmul.f32 %v527_v33, %v504_v20 }
 0x75e   :  { %v511_v23 = vpop.permute.xlu0 %510 }
 0x75f   :  { %v513_v29 = vmul.f32 %v511_v23, %v503_v18  ;;  %v532_v30 = vpop.permute.xlu1 %531 }
 0x760   :  { %v534_v31 = vmul.f32 %v532_v30, %v504_v20 }
 0x761   :  { %515 = vrot.lane.b32.xlu0 %v513_v29, %s2093_s4 }
 0x762   :  { %536 = vrot.lane.b32.xlu1 %v534_v31, %s2093_s4 }
 0x7d3   :  { %v516_v39 = vpop.permute.xlu0 %515 }
 0x7d4   :  { %v2325_v41 = vadd.f32 %v516_v39, %v508_v34  ;;  %v537_v42 = vpop.permute.xlu1 %536 }
 0x7d5   :  { %v2327_v43 = vadd.f32 %v537_v42, %v529_v40 }
 0x7d6   :  { %1922 = vtanh.f32 %v2325_v41 }
 0x7d7   :  { %1924 = vtanh.f32 %v2327_v43 }
 0x7e0   :  { %v1923_v44 = vpop.eup %1922 }
 0x7e1   :  { %v1925_v45 = vpop.eup %1924  ;;  %521 = vrot.lane.b32.xlu0 %v1923_v44, %s2092_s0 }
 0x7e2   :  { %542 = vrot.lane.b32.xlu1 %v1925_v45, %s2092_s0  ;;  %v682_v45 = vrot.slane %v2325_v41, 6 }
 0x853   :  { %v522_v22 = vpop.permute.xlu0 %521 }
 0x854   :  { %v524_v24 = vmul.f32 %v522_v22, %v503_v18  ;;  %v543_v46 = vpop.permute.xlu1 %542  ;;  %v703_v22 = vrot.slane %v2327_v43, 6 }
 0x855   :  { %v545_v47 = vmul.f32 %v543_v46, %v504_v20 }
 0x856   :  { %v525_v49 = vpack.c.bf16 %v524_v24, %v524_v24 }
 0x857   :  { %v546_v50 = vpack.c.bf16 %v545_v47, %v545_v47 }
 0x858   :  { %v548_v51 = vrot.slane %v525_v49, 2 }
 0x859   :  { %v604_v52 = vrot.slane %v546_v50, 2 }
 0x85a   :  { %549 = vrot.lane.b32.xlu0 %v548_v51, %s2093_s4 }
 0x85b   :  { %605 = vrot.lane.b32.xlu1 %v604_v52, %s2093_s4 }
 0x8cc   :  { %v550_v53 = vpop.permute.xlu0 %549 }
 0x8cd   :  { %1786 = vmatmul.mubr.msk.bf16.vlgmr.msra.gmra.mrb[8].mxu0 %vm237_vm5, %v550_v53  ;;  %v606_v55 = vpop.permute.xlu1 %605 }
 0x8ce   :  { %1787 = vmatmul.mubr.msk.bf16.vlgmr.msra.gmra.mrb[8].mxu1 %vm237_vm5, %v606_v55  ;;  %731 = vmatpush1.bf16.msra.mxu0 %v2228_v36 }
 0x8cf   :  { %732 = vmatprep.subr.bf16.mxu0 %v2233_v37  ;;  %762 = vmatprep.mubr.bf16.mxu0 %v2091_v0 }
 0x8d0   :  { %894 = vmatpush1.bf16.msra.mxu1 %v2228_v36  ;;  %925 = vmatprep.mubr.bf16.mxu1 %v2091_v0 }
 0x8d1   :  { %895 = vmatprep.subr.bf16.mxu1 %v2233_v37 }
 0x8d2   :  { %733 = vmatpush1.bf16.msra.mxu0 %v2241_v38 }
 0x8d3   :  { %780 = vmatprep.subr.bf16.mxu0 %v2280_v25 }
 0x8d4   :  { %896 = vmatpush1.bf16.msra.mxu1 %v2241_v38 }
 0x8d5   :  { %948 = vmatprep.subr.bf16.mxu1 %v2280_v25 }
 0x9a0   :  { %v588_v56 = vpop.f32.mrb[8].mxu0 }
 0x9a1   :  { %v597_v57 = vrot.slane %v588_v56, 2  ;;  %v590_v58 = vpop.f32.mrb[9].mxu0  ;;  %v644_v59 = vpop.f32.mrb[8].mxu1 }
 0x9a2   :  { %v598_v60 = vrot.slane %v590_v58, 2  ;;  %v653_v61 = vrot.slane %v644_v59, 2  ;;  %v592_v62 = vpop.f32.mrb[10].mxu0  ;;  %v646_v63 = vpop.f32.mrb[9].mxu1 }
 0x9a3   :  { %v601_v1 = vadd.f32 %v597_v57, %v2199_v13  ;;  %v654_v2 = vrot.slane %v646_v63, 2  ;;  %v593_v3 = vpop.f32.mrb[11].mxu0  ;;  %v648_v4 = vpop.f32.mrb[10].mxu1 }
 0x9a4   :  { %v602_v5 = vadd.f32 %v598_v60, %v2253_v48  ;;  %v649_v6 = vpop.f32.mrb[11].mxu1 }
 0x9a5   :  { %v657_v7 = vadd.f32 %v653_v61, %v601_v1 }
 0x9a6   :  { %v658_v8 = vadd.f32 %v654_v2, %v602_v5 }
 0x9a7   :  { %v659_v9 = vmul.f32 2.0, %v657_v7 }
 0x9a8   :  { %v660_v10 = vmul.f32 2.0, %v658_v8 }
 0x9a9   :  { %v661_v11 = vsel %vm2201_vm4, %v659_v9, %v657_v7 }
 0x9aa   :  { %v1788_v12 = vmul.f32 -1.442695, %v661_v11  ;;  %v662_v14 = vsel %vm2257_vm8, %v660_v10, %v658_v8 }
 0x9ab   :  { %v1789_v16 = vmul.f32 -1.442695, %v662_v14 }
 0x9ac   :  { %1926 = vpow2.f32 %v1788_v12 }
 0x9ad   :  { %1928 = vpow2.f32 %v1789_v16 }
 0x9b6   :  { %v1927_v13 = vpop.eup %1926 }
 0x9b7   :  { %v1929_v17 = vpop.eup %1928  ;;  %v669_v18 = vadd.f32 1.0, %v1927_v13 }
 0x9b8   :  { %v670_v20 = vadd.f32 1.0, %v1929_v17 }
 0x9b9   :  { %1930 = vrcp.f32 %v669_v18 }
 0x9ba   :  { %1932 = vrcp.f32 %v670_v20 }
 0x9c3   :  { %v1931_v48 = vpop.eup %1930 }
 0x9c4   :  { %v1933_v23 = vpop.eup %1932  ;;  %v675_v29 = vmul.f32 2.0, %v1931_v48 }
 0x9c5   :  { %v676_v30 = vmul.f32 2.0, %v1933_v23 }
 0x9c6   :  { %v1790_v31 = vadd.f32 -1.0, %v675_v29 }
 0x9c7   :  { %v1791_v32 = vadd.f32 -1.0, %v676_v30 }
 0x9c8   :  { %v679_v33 = vsel %vm2201_vm4, %v1790_v31, %v1931_v48 }
 0x9c9   :  { %686 = vrot.lane.b32.xlu0 %v679_v33, %s2092_s0  ;;  %v680_v34 = vsel %vm2257_vm8, %v1791_v32, %v1933_v23  ;;  %v684_v24 = vmul.f32 %v682_v45, %v679_v33 }
 0x9ca   :  { %707 = vrot.lane.b32.xlu1 %v680_v34, %s2092_s0  ;;  %v705_v47 = vmul.f32 %v703_v22, %v680_v34 }
 0xa3b   :  { %v687_v39 = vpop.permute.xlu0 %686 }
 0xa3c   :  { %v689_v40 = vmul.f32 %v687_v39, %v679_v33  ;;  %v708_v42 = vpop.permute.xlu1 %707 }
 0xa3d   :  { %v710_v44 = vmul.f32 %v708_v42, %v680_v34 }
 0xa3e   :  { %691 = vrot.lane.b32.xlu0 %v689_v40, %s2093_s4 }
 0xa3f   :  { %712 = vrot.lane.b32.xlu1 %v710_v44, %s2093_s4 }
 0xab0   :  { %v692_v46 = vpop.permute.xlu0 %691 }
 0xab1   :  { %v2363_v49 = vadd.f32 %v692_v46, %v684_v24  ;;  %v713_v50 = vpop.permute.xlu1 %712 }
 0xab2   :  { %v2365_v51 = vadd.f32 %v713_v50, %v705_v47 }
 0xab3   :  { %1934 = vtanh.f32 %v2363_v49  ;;  %v846_v40 = vrot.slane %v2363_v49, 6 }
 0xab4   :  { %1936 = vtanh.f32 %v2365_v51  ;;  %v867_v42 = vrot.slane %v2365_v51, 6 }
 0xabd   :  { %v1935_v52 = vpop.eup %1934 }
 0xabe   :  { %v1937_v53 = vpop.eup %1936  ;;  %697 = vrot.lane.b32.xlu0 %v1935_v52, %s2092_s0 }
 0xabf   :  { %718 = vrot.lane.b32.xlu1 %v1937_v53, %s2092_s0 }
 0xb30   :  { %v698_v41 = vpop.permute.xlu0 %697 }
 0xb31   :  { %v700_v43 = vmul.f32 %v698_v41, %v679_v33  ;;  %v719_v55 = vpop.permute.xlu1 %718 }
 0xb32   :  { %v721_v56 = vmul.f32 %v719_v55, %v680_v34 }
 0xb33   :  { %v701_v57 = vpack.c.bf16 %v700_v43, %v700_v43 }
 0xb34   :  { %v722_v58 = vpack.c.bf16 %v721_v56, %v721_v56 }
 0xb35   :  { %v724_v59 = vrot.slane %v701_v57, 3 }
 0xb36   :  { %v774_v60 = vrot.slane %v722_v58, 3 }
 0xb37   :  { %725 = vrot.lane.b32.xlu0 %v724_v59, %s2093_s4 }
 0xb38   :  { %775 = vrot.lane.b32.xlu1 %v774_v60, %s2093_s4 }
 0xba9   :  { %v726_v61 = vpop.permute.xlu0 %725 }
 0xbaa   :  { %1792 = vmatmul.mubr.msk.bf16.vlgmr.msra.gmra.mrb[12].mxu0 %vm237_vm5, %v726_v61  ;;  %v776_v62 = vpop.permute.xlu1 %775 }
 0xbab   :  { %781 = vmatpush1.bf16.msra.mxu0 %v2282_v26  ;;  %812 = vmatprep.mubr.bf16.mxu0 %v2091_v0 }
 0xbac   :  { %782 = vmatprep.subr.bf16.mxu0 %v2284_v27 }
 0xbaf   :  { %783 = vmatpush1.bf16.msra.mxu0 %v2288_v28 }
 0xbb0   :  { %1068 = vmatprep.subr.bf16.mxu0 %v2223_v35 }
 0xbb6   :  { %1793 = vmatmul.mubr.msk.bf16.vlgmr.msra.gmra.mrb[12].mxu0 %vm237_vm5, %v776_v62 }
 0xbb7   :  { %1069 = vmatpush1.bf16.msra.mxu0 %v2228_v36  ;;  %1100 = vmatprep.mubr.bf16.mxu0 %v2091_v0 }
 0xbb8   :  { %1070 = vmatprep.subr.bf16.mxu0 %v2233_v37 }
 0xbbb   :  { %1071 = vmatpush1.bf16.msra.mxu0 %v2241_v38 }
 0xbbc   :  { %1244 = vmatprep.subr.bf16.mxu0 %v2223_v35 }
 0xc89   :  { %v814_v63 = vpop.f32.mrb[12].mxu0 }
 0xc8a   :  { %v1861_v1 = vadd.f32 %v814_v63, %v2206_v19  ;;  %v816_v2 = vpop.f32.mrb[13].mxu0 }
 0xc8b   :  { %v1862_v3 = vadd.f32 %v816_v2, %v2208_v21  ;;  %v818_v4 = vpop.f32.mrb[14].mxu0 }
 0xc8c   :  { %v823_v5 = vmul.f32 2.0, %v1861_v1  ;;  %v819_v6 = vpop.f32.mrb[15].mxu0 }
 0xc8d   :  { %v824_v7 = vmul.f32 2.0, %v1862_v3 }
 0xc8e   :  { %v825_v8 = vsel %vm2201_vm4, %v823_v5, %v1861_v1 }
 0xc8f   :  { %v1794_v9 = vmul.f32 -1.442695, %v825_v8  ;;  %v826_v10 = vsel %vm2257_vm8, %v824_v7, %v1862_v3 }
 0xc90   :  { %v1795_v11 = vmul.f32 -1.442695, %v826_v10 }
 0xc91   :  { %1938 = vpow2.f32 %v1794_v9 }
 0xc92   :  { %1940 = vpow2.f32 %v1795_v11 }
 0xc9b   :  { %v1939_v12 = vpop.eup %1938 }
 0xc9c   :  { %v1941_v14 = vpop.eup %1940  ;;  %v833_v16 = vadd.f32 1.0, %v1939_v12 }
 0xc9d   :  { %v834_v13 = vadd.f32 1.0, %v1941_v14 }
 0xc9e   :  { %1942 = vrcp.f32 %v833_v16 }
 0xc9f   :  { %1944 = vrcp.f32 %v834_v13 }
 0xca8   :  { %v1943_v17 = vpop.eup %1942 }
 0xca9   :  { %v1945_v18 = vpop.eup %1944  ;;  %v839_v20 = vmul.f32 2.0, %v1943_v17 }
 0xcaa   :  { %v840_v48 = vmul.f32 2.0, %v1945_v18 }
 0xcab   :  { %v1796_v23 = vadd.f32 -1.0, %v839_v20 }
 0xcac   :  { %v1797_v29 = vadd.f32 -1.0, %v840_v48 }
 0xcad   :  { %v843_v30 = vsel %vm2201_vm4, %v1796_v23, %v1943_v17 }
 0xcae   :  { %850 = vrot.lane.b32.xlu0 %v843_v30, %s2092_s0  ;;  %v844_v31 = vsel %vm2257_vm8, %v1797_v29, %v1945_v18  ;;  %v848_v44 = vmul.f32 %v846_v40, %v843_v30 }
 0xcaf   :  { %871 = vrot.lane.b32.xlu1 %v844_v31, %s2092_s0  ;;  %v869_v22 = vmul.f32 %v867_v42, %v844_v31 }
 0xd20   :  { %v851_v32 = vpop.permute.xlu0 %850 }
 0xd21   :  { %v853_v33 = vmul.f32 %v851_v32, %v843_v30  ;;  %v872_v34 = vpop.permute.xlu1 %871 }
 0xd22   :  { %v874_v39 = vmul.f32 %v872_v34, %v844_v31 }
 0xd23   :  { %855 = vrot.lane.b32.xlu0 %v853_v33, %s2093_s4 }
 0xd24   :  { %876 = vrot.lane.b32.xlu1 %v874_v39, %s2093_s4 }
 0xd95   :  { %v856_v45 = vpop.permute.xlu0 %855 }
 0xd96   :  { %v2401_v24 = vadd.f32 %v856_v45, %v848_v44  ;;  %v877_v46 = vpop.permute.xlu1 %876 }
 0xd97   :  { %v2403_v47 = vadd.f32 %v877_v46, %v869_v22 }
 0xd98   :  { %1946 = vtanh.f32 %v2401_v24  ;;  %v1020_v46 = vrot.slane %v2401_v24, 6 }
 0xd99   :  { %1948 = vtanh.f32 %v2403_v47 }
 0xda2   :  { %v1947_v50 = vpop.eup %1946 }
 0xda3   :  { %v1949_v52 = vpop.eup %1948  ;;  %861 = vrot.lane.b32.xlu0 %v1947_v50, %s2092_s0  ;;  %v1041_v50 = vrot.slane %v2403_v47, 6 }
 0xda4   :  { %882 = vrot.lane.b32.xlu1 %v1949_v52, %s2092_s0 }
 0xe15   :  { %v862_v49 = vpop.permute.xlu0 %861 }
 0xe16   :  { %v864_v51 = vmul.f32 %v862_v49, %v843_v30  ;;  %v883_v53 = vpop.permute.xlu1 %882 }
 0xe17   :  { %v885_v41 = vmul.f32 %v883_v53, %v844_v31 }
 0xe18   :  { %v865_v43 = vpack.c.bf16 %v864_v51, %v864_v51 }
 0xe19   :  { %v886_v55 = vpack.c.bf16 %v885_v41, %v885_v41 }
 0xe1a   :  { %888 = vrot.lane.b32.xlu0 %v865_v43, %s2093_s4 }
 0xe1b   :  { %943 = vrot.lane.b32.xlu1 %v886_v55, %s2093_s4 }
 0xe8c   :  { %v889_v56 = vpop.permute.xlu0 %888 }
 0xe8d   :  { %1798 = vmatmul.mubr.msk.bf16.vlgmr.msra.gmra.mrb[12].mxu1 %vm237_vm5, %v889_v56  ;;  %v944_v57 = vpop.permute.xlu1 %943 }
 0xe8e   :  { %949 = vmatpush1.bf16.msra.mxu1 %v2282_v26  ;;  %980 = vmatprep.mubr.bf16.mxu1 %v2091_v0 }
 0xe8f   :  { %950 = vmatprep.subr.bf16.mxu1 %v2284_v27 }
 0xe92   :  { %951 = vmatpush1.bf16.msra.mxu1 %v2288_v28 }
 0xe93   :  { %1124 = vmatprep.subr.bf16.mxu1 %v2280_v25 }
 0xe95   :  { %1799 = vmatmul.mubr.msk.bf16.vlgmr.msra.gmra.mrb[16].mxu1 %vm237_vm5, %v944_v57 }
 0xe96   :  { %1125 = vmatpush1.bf16.msra.mxu1 %v2282_v26  ;;  %1156 = vmatprep.mubr.bf16.mxu1 %v2091_v0 }
 0xe97   :  { %1126 = vmatprep.subr.bf16.mxu1 %v2284_v27 }
 0xe9a   :  { %1127 = vmatpush1.bf16.msra.mxu1 %v2288_v28 }
 0xe9b   :  { %1300 = vmatprep.subr.bf16.mxu1 %v2280_v25 }
 0xf60   :  { %v927_v58 = vpop.f32.mrb[12].mxu1 }
 0xf61   :  { %v929_v59 = vpop.f32.mrb[13].mxu1  ;;  %v936_v62 = vrot.slane %v927_v58, 6 }
 0xf62   :  { %v931_v60 = vpop.f32.mrb[14].mxu1  ;;  %v937_v63 = vrot.slane %v929_v59, 6 }
 0xf63   :  { %v932_v61 = vpop.f32.mrb[15].mxu1  ;;  %v940_v2 = vadd.f32 %v936_v62, %v2206_v19 }
 0xf64   :  { %v941_v5 = vadd.f32 %v937_v63, %v2208_v21 }
 0xf68   :  { %v982_v1 = vpop.f32.mrb[16].mxu1 }
 0xf69   :  { %v991_v3 = vrot.slane %v982_v1, 6  ;;  %v984_v4 = vpop.f32.mrb[17].mxu1 }
 0xf6a   :  { %v992_v6 = vrot.slane %v984_v4, 6  ;;  %v986_v7 = vpop.f32.mrb[18].mxu1 }
 0xf6b   :  { %v995_v8 = vadd.f32 %v991_v3, %v940_v2  ;;  %v987_v9 = vpop.f32.mrb[19].mxu1 }
 0xf6c   :  { %v996_v10 = vadd.f32 %v992_v6, %v941_v5 }
 0xf6d   :  { %v997_v11 = vmul.f32 2.0, %v995_v8 }
 0xf6e   :  { %v998_v12 = vmul.f32 2.0, %v996_v10 }
 0xf6f   :  { %v999_v14 = vsel %vm2201_vm4, %v997_v11, %v995_v8 }
 0xf70   :  { %v1800_v16 = vmul.f32 -1.442695, %v999_v14  ;;  %v1000_v13 = vsel %vm2257_vm8, %v998_v12, %v996_v10 }
 0xf71   :  { %v1801_v17 = vmul.f32 -1.442695, %v1000_v13 }
 0xf72   :  { %1950 = vpow2.f32 %v1800_v16 }
 0xf73   :  { %1952 = vpow2.f32 %v1801_v17 }
 0xf7c   :  { %v1951_v18 = vpop.eup %1950 }
 0xf7d   :  { %v1953_v20 = vpop.eup %1952  ;;  %v1007_v48 = vadd.f32 1.0, %v1951_v18 }
 0xf7e   :  { %v1008_v23 = vadd.f32 1.0, %v1953_v20 }
 0xf7f   :  { %1954 = vrcp.f32 %v1007_v48 }
 0xf80   :  { %1956 = vrcp.f32 %v1008_v23 }
 0xf89   :  { %v1955_v29 = vpop.eup %1954 }
 0xf8a   :  { %v1957_v30 = vpop.eup %1956  ;;  %v1013_v31 = vmul.f32 2.0, %v1955_v29 }
 0xf8b   :  { %v1014_v32 = vmul.f32 2.0, %v1957_v30 }
 0xf8c   :  { %v1802_v33 = vadd.f32 -1.0, %v1013_v31 }
 0xf8d   :  { %v1803_v34 = vadd.f32 -1.0, %v1014_v32 }
 0xf8e   :  { %v1017_v39 = vsel %vm2201_vm4, %v1802_v33, %v1955_v29 }
 0xf8f   :  { %1024 = vrot.lane.b32.xlu0 %v1017_v39, %s2092_s0  ;;  %v1018_v40 = vsel %vm2257_vm8, %v1803_v34, %v1957_v30  ;;  %v1022_v52 = vmul.f32 %v1020_v46, %v1017_v39 }
 0xf90   :  { %1045 = vrot.lane.b32.xlu1 %v1018_v40, %s2092_s0  ;;  %v1043_v51 = vmul.f32 %v1041_v50, %v1018_v40 }
0x1001   :  { %v1025_v42 = vpop.permute.xlu0 %1024 }
0x1002   :  { %v1027_v44 = vmul.f32 %v1025_v42, %v1017_v39  ;;  %v1046_v45 = vpop.permute.xlu1 %1045 }
0x1003   :  { %v1048_v22 = vmul.f32 %v1046_v45, %v1018_v40 }
0x1004   :  { %1029 = vrot.lane.b32.xlu0 %v1027_v44, %s2093_s4 }
0x1005   :  { %1050 = vrot.lane.b32.xlu1 %v1048_v22, %s2093_s4 }
0x1076   :  { %v1030_v49 = vpop.permute.xlu0 %1029 }
0x1077   :  { %v2439_v53 = vadd.f32 %v1030_v49, %v1022_v52  ;;  %v1051_v41 = vpop.permute.xlu1 %1050 }
0x1078   :  { %v2441_v43 = vadd.f32 %v1051_v41, %v1043_v51 }
0x1079   :  { %1958 = vtanh.f32 %v2439_v53  ;;  %v1196_v41 = vrot.slane %v2439_v53, 6 }
0x107a   :  { %1960 = vtanh.f32 %v2441_v43 }
0x1083   :  { %v1959_v55 = vpop.eup %1958 }
0x1084   :  { %v1961_v56 = vpop.eup %1960  ;;  %1035 = vrot.lane.b32.xlu0 %v1959_v55, %s2092_s0  ;;  %v1217_v55 = vrot.slane %v2441_v43, 6 }
0x1085   :  { %1056 = vrot.lane.b32.xlu1 %v1961_v56, %s2092_s0 }
0x10f6   :  { %v1036_v24 = vpop.permute.xlu0 %1035 }
0x10f7   :  { %v1038_v47 = vmul.f32 %v1036_v24, %v1017_v39  ;;  %v1057_v57 = vpop.permute.xlu1 %1056 }
0x10f8   :  { %v1059_v58 = vmul.f32 %v1057_v57, %v1018_v40 }
0x10f9   :  { %v1039_v59 = vpack.c.bf16 %v1038_v47, %v1038_v47 }
0x10fa   :  { %v1060_v60 = vpack.c.bf16 %v1059_v58, %v1059_v58 }
0x10fb   :  { %v1062_v61 = vrot.slane %v1039_v59, 1 }
0x10fc   :  { %v1118_v62 = vrot.slane %v1060_v60, 1 }
0x10fd   :  { %1063 = vrot.lane.b32.xlu0 %v1062_v61, %s2093_s4 }
0x10fe   :  { %1119 = vrot.lane.b32.xlu1 %v1118_v62, %s2093_s4 }
0x116f   :  { %v1064_v63 = vpop.permute.xlu0 %1063 }
0x1170   :  { %1804 = vmatmul.mubr.msk.bf16.vlgmr.msra.gmra.mrb[16].mxu0 %vm237_vm5, %v1064_v63  ;;  %v1120_v1 = vpop.permute.xlu1 %1119 }
0x1171   :  { %1805 = vmatmul.mubr.msk.bf16.vlgmr.msra.gmra.mrb[20].mxu1 %vm237_vm5, %v1120_v1  ;;  %1245 = vmatpush1.bf16.msra.mxu0 %v2228_v36 }
0x1172   :  { %1301 = vmatpush1.bf16.msra.mxu1 %v2282_v26  ;;  %1246 = vmatprep.subr.bf16.mxu0 %v2233_v37 }
0x1173   :  { %1302 = vmatprep.subr.bf16.mxu1 %v2284_v27  ;;  %1276 = vmatprep.mubr.bf16.mxu0 %v2091_v0 }
0x1174   :  { %1332 = vmatprep.mubr.bf16.mxu1 %v2091_v0 }
0x1175   :  { %1247 = vmatpush1.bf16.msra.mxu0 %v2241_v38 }
0x1176   :  { %1303 = vmatpush1.bf16.msra.mxu1 %v2288_v28  ;;  %1420 = vmatprep.subr.bf16.mxu0 %v2223_v35 }
0x1177   :  { %1471 = vmatprep.subr.bf16.mxu1 %v2280_v25 }
0x1243   :  { %v1102_v2 = vpop.f32.mrb[16].mxu0 }
0x1244   :  { %v1111_v3 = vrot.slane %v1102_v2, 4  ;;  %v1104_v4 = vpop.f32.mrb[17].mxu0  ;;  %v1158_v5 = vpop.f32.mrb[20].mxu1 }
0x1245   :  { %v1112_v6 = vrot.slane %v1104_v4, 4  ;;  %v1167_v7 = vrot.slane %v1158_v5, 4  ;;  %v1106_v8 = vpop.f32.mrb[18].mxu0  ;;  %v1160_v9 = vpop.f32.mrb[21].mxu1 }
0x1246   :  { %v1115_v10 = vadd.f32 %v1111_v3, %v2206_v19  ;;  %v1168_v11 = vrot.slane %v1160_v9, 4  ;;  %v1107_v12 = vpop.f32.mrb[19].mxu0  ;;  %v1162_v14 = vpop.f32.mrb[22].mxu1 }
0x1247   :  { %v1116_v16 = vadd.f32 %v1112_v6, %v2208_v21  ;;  %v1163_v13 = vpop.f32.mrb[23].mxu1 }
0x1248   :  { %v1171_v17 = vadd.f32 %v1167_v7, %v1115_v10 }
0x1249   :  { %v1172_v35 = vadd.f32 %v1168_v11, %v1116_v16 }
0x124a   :  { %v1173_v18 = vmul.f32 2.0, %v1171_v17 }
0x124b   :  { %v1174_v25 = vmul.f32 2.0, %v1172_v35 }
0x124c   :  { %v1175_v20 = vsel %vm2201_vm4, %v1173_v18, %v1171_v17 }
0x124d   :  { %v1806_v48 = vmul.f32 -1.442695, %v1175_v20  ;;  %v1176_v23 = vsel %vm2257_vm8, %v1174_v25, %v1172_v35 }
0x124e   :  { %v1807_v29 = vmul.f32 -1.442695, %v1176_v23 }
0x124f   :  { %1962 = vpow2.f32 %v1806_v48 }
0x1250   :  { %1964 = vpow2.f32 %v1807_v29 }
0x1259   :  { %v1963_v30 = vpop.eup %1962 }
0x125a   :  { %v1965_v31 = vpop.eup %1964  ;;  %v1183_v32 = vadd.f32 1.0, %v1963_v30 }
0x125b   :  { %v1184_v33 = vadd.f32 1.0, %v1965_v31 }
0x125c   :  { %1966 = vrcp.f32 %v1183_v32 }
0x125d   :  { %1968 = vrcp.f32 %v1184_v33 }
0x1266   :  { %v1967_v34 = vpop.eup %1966 }
0x1267   :  { %v1969_v39 = vpop.eup %1968  ;;  %v1189_v40 = vmul.f32 2.0, %v1967_v34 }
0x1268   :  { %v1190_v42 = vmul.f32 2.0, %v1969_v39 }
0x1269   :  { %v1808_v44 = vadd.f32 -1.0, %v1189_v40 }
0x126a   :  { %v1809_v45 = vadd.f32 -1.0, %v1190_v42 }
0x126b   :  { %v1193_v22 = vsel %vm2201_vm4, %v1808_v44, %v1967_v34 }
0x126c   :  { %1200 = vrot.lane.b32.xlu0 %v1193_v22, %s2092_s0  ;;  %v1194_v46 = vsel %vm2257_vm8, %v1809_v45, %v1969_v39  ;;  %v1198_v56 = vmul.f32 %v1196_v41, %v1193_v22 }
0x126d   :  { %1221 = vrot.lane.b32.xlu1 %v1194_v46, %s2092_s0  ;;  %v1219_v47 = vmul.f32 %v1217_v55, %v1194_v46 }
0x12de   :  { %v1201_v50 = vpop.permute.xlu0 %1200 }
0x12df   :  { %v1203_v52 = vmul.f32 %v1201_v50, %v1193_v22  ;;  %v1222_v49 = vpop.permute.xlu1 %1221 }
0x12e0   :  { %v1224_v51 = vmul.f32 %v1222_v49, %v1194_v46 }
0x12e1   :  { %1205 = vrot.lane.b32.xlu0 %v1203_v52, %s2093_s4 }
0x12e2   :  { %1226 = vrot.lane.b32.xlu1 %v1224_v51, %s2093_s4 }
0x1353   :  { %v1206_v24 = vpop.permute.xlu0 %1205 }
0x1354   :  { %v2477_v57 = vadd.f32 %v1206_v24, %v1198_v56  ;;  %v1227_v58 = vpop.permute.xlu1 %1226 }
0x1355   :  { %v2479_v59 = vadd.f32 %v1227_v58, %v1219_v47 }
0x1356   :  { %1970 = vtanh.f32 %v2477_v57  ;;  %v1372_v52 = vrot.slane %v2477_v57, 6 }
0x1357   :  { %1972 = vtanh.f32 %v2479_v59  ;;  %v1393_v15 = vrot.slane %v2479_v59, 6 }
0x1360   :  { %v1971_v60 = vpop.eup %1970 }
0x1361   :  { %v1973_v61 = vpop.eup %1972  ;;  %1211 = vrot.lane.b32.xlu0 %v1971_v60, %s2092_s0 }
0x1362   :  { %1232 = vrot.lane.b32.xlu1 %v1973_v61, %s2092_s0 }
0x13d3   :  { %v1212_v53 = vpop.permute.xlu0 %1211 }
0x13d4   :  { %v1214_v43 = vmul.f32 %v1212_v53, %v1193_v22  ;;  %v1233_v62 = vpop.permute.xlu1 %1232 }
0x13d5   :  { %v1235_v63 = vmul.f32 %v1233_v62, %v1194_v46 }
0x13d6   :  { %v1215_v1 = vpack.c.bf16 %v1214_v43, %v1214_v43 }
0x13d7   :  { %v1236_v2 = vpack.c.bf16 %v1235_v63, %v1235_v63 }
0x13d8   :  { %v1238_v3 = vrot.slane %v1215_v1, 2 }
0x13d9   :  { %v1294_v4 = vrot.slane %v1236_v2, 2 }
0x13da   :  { %1239 = vrot.lane.b32.xlu0 %v1238_v3, %s2093_s4 }
0x13db   :  { %1295 = vrot.lane.b32.xlu1 %v1294_v4, %s2093_s4 }
0x144c   :  { %v1240_v5 = vpop.permute.xlu0 %1239 }
0x144d   :  { %1810 = vmatmul.mubr.msk.bf16.vlgmr.msra.gmra.mrb[20].mxu0 %vm237_vm5, %v1240_v5  ;;  %v1296_v6 = vpop.permute.xlu1 %1295 }
0x144e   :  { %1811 = vmatmul.mubr.msk.bf16.vlgmr.msra.gmra.mrb[24].mxu1 %vm237_vm5, %v1296_v6  ;;  %1421 = vmatpush1.bf16.msra.mxu0 %v2228_v36 }
0x144f   :  { %1472 = vmatpush1.bf16.msra.mxu1 %v2282_v26  ;;  %1422 = vmatprep.subr.bf16.mxu0 %v2233_v37 }
0x1450   :  { %1473 = vmatprep.subr.bf16.mxu1 %v2284_v27  ;;  %1452 = vmatprep.mubr.bf16.mxu0 %v2091_v0 }
0x1451   :  { %1503 = vmatprep.mubr.bf16.mxu1 %v2091_v0 }
0x1452   :  { %1423 = vmatpush1.bf16.msra.mxu0 %v2241_v38 }
0x1453   :  { %1474 = vmatpush1.bf16.msra.mxu1 %v2288_v28 }
0x1520   :  { %v1278_v7 = vpop.f32.mrb[20].mxu0 }
0x1521   :  { %v1287_v8 = vrot.slane %v1278_v7, 2  ;;  %v1280_v9 = vpop.f32.mrb[21].mxu0  ;;  %v1334_v10 = vpop.f32.mrb[24].mxu1 }
0x1522   :  { %v1288_v11 = vrot.slane %v1280_v9, 2  ;;  %v1343_v36 = vrot.slane %v1334_v10, 2  ;;  %v1282_v12 = vpop.f32.mrb[22].mxu0  ;;  %v1336_v26 = vpop.f32.mrb[25].mxu1 }
0x1523   :  { %v1291_v37 = vadd.f32 %v1287_v8, %v2206_v19  ;;  %v1344_v14 = vrot.slane %v1336_v26, 2  ;;  %v1283_v27 = vpop.f32.mrb[23].mxu0  ;;  %v1338_v16 = vpop.f32.mrb[26].mxu1 }
0x1524   :  { %v1292_v13 = vadd.f32 %v1288_v11, %v2208_v21  ;;  %v1339_v0 = vpop.f32.mrb[27].mxu1 }
0x1525   :  { %v1347_v17 = vadd.f32 %v1343_v36, %v1291_v37 }
0x1526   :  { %v1348_v38 = vadd.f32 %v1344_v14, %v1292_v13 }
0x1527   :  { %v1349_v35 = vmul.f32 2.0, %v1347_v17 }
0x1528   :  { %v1350_v28 = vmul.f32 2.0, %v1348_v38 }
0x1529   :  { %v1351_v18 = vsel %vm2201_vm4, %v1349_v35, %v1347_v17 }
0x152a   :  { %v1812_v25 = vmul.f32 -1.442695, %v1351_v18  ;;  %v1352_v20 = vsel %vm2257_vm8, %v1350_v28, %v1348_v38 }
0x152b   :  { %v1813_v48 = vmul.f32 -1.442695, %v1352_v20 }
0x152c   :  { %1974 = vpow2.f32 %v1812_v25 }
0x152d   :  { %1976 = vpow2.f32 %v1813_v48  ;;  %v1891_v48 = vld [vmem:[%s2574_s5] sm:$0xff]  }
0x1536   :  { %v1975_v19 = vpop.eup %1974 }
0x1537   :  { %v1977_v23 = vpop.eup %1976  ;;  %v1359_v29 = vadd.f32 1.0, %v1975_v19  ;;  %v2094_v19 = vmov 0.0  }
0x1538   :  { %v1360_v30 = vadd.f32 1.0, %v1977_v23  ;;  %1839 = vmatprep.subr.bf16.mxu0 %v2094_v19  ;;  %1847 = vmatprep.subr.bf16.mxu1 %v2094_v19 }
0x1539   :  { %1978 = vrcp.f32 %v1359_v29  ;;  %v1893_v29 = vld [vmem:[%s2576_s7] sm:$0xff]  }
0x153a   :  { %1980 = vrcp.f32 %v1360_v30 }
0x1543   :  { %v1979_v31 = vpop.eup %1978 }
0x1544   :  { %v1981_v32 = vpop.eup %1980  ;;  %v1365_v33 = vmul.f32 2.0, %v1979_v31 }
0x1545   :  { %v1366_v34 = vmul.f32 2.0, %v1981_v32 }
0x1546   :  { %v1814_v39 = vadd.f32 -1.0, %v1365_v33 }
0x1547   :  { %v1815_v40 = vadd.f32 -1.0, %v1366_v34 }
0x1548   :  { %v1369_v42 = vsel %vm2201_vm4, %v1814_v39, %v1979_v31  ;;  %v1894_v39 = vld [vmem:[%s2576_s7 + $0x8] sm:$0xff]  }
0x1549   :  { %1376 = vrot.lane.b32.xlu0 %v1369_v42, %s2092_s0  ;;  %v1370_v44 = vsel %vm2257_vm8, %v1815_v40, %v1981_v32  ;;  %v1374_v49 = vmul.f32 %v1372_v52, %v1369_v42  ;;  %v1895_v40 = vld [vmem:[%s2578_s9] sm:$0xff]  }
0x154a   :  { %1397 = vrot.lane.b32.xlu1 %v1370_v44, %s2092_s0  ;;  %v1395_v41 = vmul.f32 %v1393_v15, %v1370_v44 }
0x15bb   :  { %v1377_v45 = vpop.permute.xlu0 %1376 }
0x15bc   :  { %v1379_v22 = vmul.f32 %v1377_v45, %v1369_v42  ;;  %v1398_v46 = vpop.permute.xlu1 %1397 }
0x15bd   :  { %v1400_v50 = vmul.f32 %v1398_v46, %v1370_v44 }
0x15be   :  { %1381 = vrot.lane.b32.xlu0 %v1379_v22, %s2093_s4 }
0x15bf   :  { %1402 = vrot.lane.b32.xlu1 %v1400_v50, %s2093_s4 }
0x1630   :  { %v1382_v51 = vpop.permute.xlu0 %1381 }
0x1631   :  { %v1384_v55 = vadd.f32 %v1382_v51, %v1374_v49  ;;  %v1403_v56 = vpop.permute.xlu1 %1402  ;;  %v1824_v49 = vld [vmem:[%s2577_s8] ss:$0 sm:$0xff]  ;;  %s2058_s8 = scalar_lea.vmem %s1752_s16, 32 }
0x1632   :  { %v1405_v24 = vadd.f32 %v1403_v56, %v1395_v41  ;;  %p2059_p10 = scmp.ne.s32.totalorder %s1752_s16, %s2058_s8  ;;  %p2064_p12 = scmp.lt.s32.totalorder %s2058_s8, %s2058_s8 }
0x1633   :  { %1982 = vtanh.f32 %v1384_v55 }
0x1634   :  { %1984 = vtanh.f32 %v1405_v24  ;;  %p2065_p13 = por %p2064_p12, %p2063_p11 }
0x1636   :  { %p2066_p0 = pnand %p2065_p13, %p2059_p10 }
0x163d   :  { %v1983_v47 = vpop.eup %1982 }
0x163e   :  { %v1985_v58 = vpop.eup %1984  ;;  %1387 = vrot.lane.b32.xlu0 %v1983_v47, %s2092_s0 }
0x163f   :  { %1408 = vrot.lane.b32.xlu1 %v1985_v58, %s2092_s0 }
0x16b0   :  { %v1388_v60 = vpop.permute.xlu0 %1387 }
0x16b1   :  { %v1390_v61 = vmul.f32 %v1388_v60, %v1369_v42  ;;  %v1409_v53 = vpop.permute.xlu1 %1408  ;;  %v1820_v42 = vld [vmem:[%s2575_s6] ss:$0 sm:$0xff] }
0x16b2   :  { %v1411_v57 = vmul.f32 %v1409_v53, %v1370_v44  ;;  %v1828_v60 = vld [vmem:[%s2579_s10] ss:$0 sm:$0xff] }
0x16b3   :  { %v1391_v43 = vpack.c.bf16 %v1390_v61, %v1390_v61 }
0x16b4   :  { %v1412_v59 = vpack.c.bf16 %v1411_v57, %v1411_v57 }
0x16b5   :  { %v1414_v62 = vrot.slane %v1391_v43, 3 }
0x16b6   :  { %v1465_v63 = vrot.slane %v1412_v59, 3 }
0x16b7   :  { %1415 = vrot.lane.b32.xlu0 %v1414_v62, %s2093_s4 }
0x16b8   :  { %1466 = vrot.lane.b32.xlu1 %v1465_v63, %s2093_s4 }
0x1729   :  { %v1416_v1 = vpop.permute.xlu0 %1415 }
0x172a   :  { %1816 = vmatmul.mubr.msk.bf16.vlgmr.msra.gmra.mrb[24].mxu0 %vm237_vm5, %v1416_v1  ;;  %v1467_v2 = vpop.permute.xlu1 %1466 }
0x172b   :  { %1817 = vmatmul.mubr.msk.bf16.vlgmr.msra.gmra.mrb[28].mxu1 %vm237_vm5, %v1467_v2  ;;  %1843 = vmatprep.mubr.msk.bf16.mxu0 %vm2095_vm9, %v2094_v19 }
0x172c   :  { %1840 = vmatpush3.bf16.msra.mxu0 %v1891_v48  ;;  %1851 = vmatprep.mubr.msk.bf16.mxu1 %vm2095_vm9, %v2094_v19 }
0x172d   :  { %1841 = vmatprep.subr.bf16.mxu0 %v2094_v19  ;;  %1848 = vmatpush3.bf16.msra.mxu1 %v1893_v29 }
0x172e   :  { %1849 = vmatprep.subr.bf16.mxu1 %v2094_v19 }
0x1730   :  { %1842 = vmatpush3.bf16.msra.mxu0 %v1892_v54 }
0x1731   :  { %1855 = vmatprep.subr.bf16.mxu0 %v2094_v19  ;;  %1850 = vmatpush3.bf16.msra.mxu1 %v1894_v39 }
0x17fd   :  { %v1454_v3 = vpop.f32.mrb[24].mxu0 }
0x17fe   :  { %v1455_v4 = vpop.f32.mrb[25].mxu0  ;;  %v1505_v5 = vpop.f32.mrb[28].mxu1 }
0x17ff   :  { %v1461_v6 = vrot.slane %v1455_v4, 2  ;;  %v1457_v7 = vpop.f32.mrb[26].mxu0  ;;  %v1506_v8 = vpop.f32.mrb[29].mxu1 }
0x1800   :  { %v1512_v9 = vrot.slane %v1506_v8, 2  ;;  %v1458_v10 = vpop.f32.mrb[27].mxu0  ;;  %v1508_v11 = vpop.f32.mrb[30].mxu1 }
0x1801   :  { %v1463_v36 = vadd.f32 %v1461_v6, %v2208_v21  ;;  %v1509_v12 = vpop.f32.mrb[31].mxu1 }
0x1803   :  { %v1514_v26 = vadd.f32 %v1512_v9, %v1463_v36 }
0x1805   :  { %v1515_v37 = vmul.f32 2.0, %v1514_v26 }
0x1807   :  { %v1516_v14 = vsel %vm2257_vm8, %v1515_v37, %v1514_v26 }
0x1808   :  { %v1818_v27 = vmul.f32 -1.442695, %v1516_v14 }
0x180a   :  { %1986 = vpow2.f32 %v1818_v27 }
0x1814   :  { %v1987_v16 = vpop.eup %1986 }
0x1815   :  { %v1520_v13 = vadd.f32 1.0, %v1987_v16 }
0x1817   :  { %1988 = vrcp.f32 %v1520_v13 }
0x1821   :  { %v1989_v0 = vpop.eup %1988 }
0x1822   :  { %v1523_v17 = vmul.f32 2.0, %v1989_v0 }
0x1824   :  { %v1819_v38 = vadd.f32 -1.0, %v1523_v17 }
0x1826   :  { %v1525_v35 = vsel %vm2257_vm8, %v1819_v38, %v1989_v0 }
0x1827   :  { %1528 = vrot.lane.b32.xlu0 %v1525_v35, %s2092_s0  ;;  %v1526_v18 = vmul.f32 %v1525_v35, %v1405_v24 }
0x1899   :  { %v1529_v21 = vpop.permute.xlu0 %1528 }
0x189a   :  { %v1531_v28 = vmul.f32 %v1529_v21, %v1525_v35 }
0x189c   :  { %1533 = vrot.lane.b32.xlu1 %v1531_v28, %s2093_s4 }
0x190e   :  { %v1534_v25 = vpop.permute.xlu1 %1533 }
0x190f   :  { %v1536_v20 = vadd.f32 %v1534_v25, %v1526_v18 }
0x1911   :  { %1990 = vtanh.f32 %v1536_v20 }
0x191b   :  { %v1991_v23 = vpop.eup %1990 }
0x191c   :  { %1539 = vrot.lane.b32.xlu0 %v1991_v23, %s2092_s0 }
0x198e   :  { %v1540_v30 = vpop.permute.xlu0 %1539 }
0x198f   :  { %v1542_v31 = vmul.f32 %v1540_v30, %v1525_v35 }
0x1991   :  { %v1543_v32 = vpack.c.bf16 %v1542_v31, %v1542_v31 }
0x1993   :  { %v1556_v33 = vrot.slane %v1543_v32, 3 }
0x1995   :  { %1557 = vrot.lane.b32.xlu1 %v1556_v33, %s2093_s4 }
0x1a07   :  { %v1558_v34 = vpop.permute.xlu1 %1557 }
0x1a08   :  { %1844 = vmatmul.mubr.msk.bf16.vlgmr.msra.gmra.mrb[28].mxu0 %vm237_vm5, %v1558_v34 }
0x1a09   :  { %1857 = vmatprep.mubr.msk.bf16.mxu0 %vm2095_vm9, %v2094_v19  ;;  %1856 = vmatpush3.bf16.msra.mxu0 %v1895_v40 }
0x1adb   :  { %v1608_v44 = vpop.f32.mrb[28].mxu0 }
0x1adc   :  { %v1609_v45 = vadd.f32 %v1820_v42, %v1608_v44  ;;  %v1845_v22 = vpop.f32.mrb[29].mxu0 }
0x1add   :  { %v1611_v46 = vpop.f32.mrb[30].mxu0 }
0x1ade   :  { %v1614_v50 = vmax.f32 %v1609_v45, 0.0  ;;  %v1846_v52 = vpop.f32.mrb[31].mxu0 }
0x1ae0   :  { %v1615_v15 = vpack.c.bf16 %v1614_v50, %v1614_v50 }
0x1ae2   :  { %1852 = vmatmul.mubr.msk.bf16.vlgmr.msra.gmra.mrb[32].mxu1 %vm237_vm5, %v1615_v15 }
0x1bb5   :  { %v1676_v51 = vpop.f32.mrb[32].mxu1 }
0x1bb6   :  { %v1677_v41 = vadd.f32 %v1824_v49, %v1676_v51  ;;  %v1853_v55 = vpop.f32.mrb[33].mxu1 }
0x1bb7   :  { %v1679_v56 = vpop.f32.mrb[34].mxu1 }
0x1bb8   :  { %v1682_v24 = vmax.f32 %v1677_v41, 0.0  ;;  %v1854_v47 = vpop.f32.mrb[35].mxu1 }
0x1bba   :  { %v1683_v58 = vpack.c.bf16 %v1682_v24, %v1682_v24 }
0x1bbc   :  { %1858 = vmatmul.mubr.msk.bf16.vlgmr.msra.gmra.mrb[32].mxu0 %vm1699_vm10, %v1683_v58 }
0x1c8f   :  { %v1737_v61 = vpop.f32.mrb[32].mxu0 }
0x1c90   :  { %v1738_v53 = vadd.f32 %v1828_v60, %v1737_v61  ;;  %v1859_v57 = vpop.f32.mrb[33].mxu0 }
0x1c91   :  { %v1740_v43 = vpop.f32.mrb[34].mxu0 }
0x1c92   :  { %v1860_v59 = vpop.f32.mrb[35].mxu0  ;;  %1744 = vst.msk [vmem:[#allocation8] sm:$0x3] %vm1743_vm11, %v1738_v53 }
0x1c93   :  { %2069 = shalt.err (!%p2066_p0)
}
0x1c94   :  { %s2070_s10 = scalar_lea.hbm %s2580_s11, 32 }
0x1c95   :  { %p2071_p1 = scmp.ne.s32.totalorder %s2580_s11, %s2070_s10  ;;  %p2074_p2 = scmp.lt.u32.totalorder %s2070_s10, %s2580_s11 }
0x1c97   :  { %p2076_p3 = pnand %p2074_p2, %p2071_p1 }
0x1c99   :  { %2079 = shalt.err (!%p2076_p3)
}
0x1c9a   :  { %1754 = dma.vmem_to_hbm [thread:$0]  %s1752_s16, 32, %s2580_s11, [#allocation4]  }
0x1c9b   :  { %2084 = dma.done.wait [#allocation4], 32  }
0x1c9c   :  { %2085 = vsyncadd [#allocation4], 4294967264 }
0x1c9d   :  { %1758 = vsyncpa [#allocation3], 1 }
0x1c9e   :  { %1759 = vsyncpa [#allocation6], 1 }
0x1c9f   :  { %1760 = vsyncpa [#allocation4], 1 }

</bundles_post_ra>
